<compile_context>
chip_gen: v6e
topology: v6e:2x2x1
jax: 0.10.0
libtpu: 0.0.40
codegen_flags: <defaults>
</compile_context>

<pallas_src>
import functools

import numpy as np
import jax
import jax.numpy as jnp
from jax.experimental import pallas as pl
from jax.experimental.pallas import tpu as pltpu


# ----------------------- host-side operator construction (compile-time constants) ----------

def bilinear_upsample_matrix(n: int) -> np.ndarray:
    """(2n, n) matrix == F.interpolate(scale_factor=2, mode='bilinear', align_corners=False)."""
    m = np.zeros((2 * n, n), dtype=np.float32)
    for o in range(2 * n):
        src = (o + 0.5) / 2.0 - 0.5
        src = max(src, 0.0)                       # PyTorch clamps negative source coords
        x0 = int(np.floor(src))
        x1 = min(x0 + 1, n - 1)
        w1 = src - x0
        m[o, x0] += 1.0 - w1
        m[o, x1] += w1
    return m


def blur_band_matrix(n: int, k1d) -> np.ndarray:
    """(n, n) matrix == zero-padded 1D conv with (symmetric) kernel k1d."""
    m = np.zeros((n, n), dtype=np.float32)
    r = len(k1d) // 2
    for i in range(n):
        for t, kv in enumerate(k1d):
            j = i + t - r
            if 0 <= j < n:
                m[i, j] += float(kv)
    return m


def make_operators(H, W):
    """Fused upsample+blur operator (flattened-spatial) + the 9 conv-tap border masks."""
    H2, W2 = 2 * H, 2 * W
    k1d = np.array([0.25, 0.5, 0.25], np.float32)     # [1,2,1]^2 / 16, separable
    A_h = blur_band_matrix(H2, k1d) @ bilinear_upsample_matrix(H)   # (H2, H)
    A_w = blur_band_matrix(W2, k1d) @ bilinear_upsample_matrix(W)   # (W2, W)
    # K_up[h*W + w, y*W2 + x] = A_h[y, h] * A_w[x, w]  ->  ub_flat = x_flat @ K_up
    K_up = np.kron(A_h, A_w).T.astype(np.float32)                   # (H*W, H2*W2)

    # Border (zero-padding) masks for the 9 conv taps, in flattened lane layout.
    masks = np.zeros((9, 1, H2 * W2), np.float32)
    ys = np.arange(H2)[:, None]
    xs = np.arange(W2)[None, :]
    for dy in range(3):
        for dx in range(3):
            valid = ((ys + dy - 1 >= 0) & (ys + dy - 1 < H2) &
                     (xs + dx - 1 >= 0) & (xs + dx - 1 < W2))
            masks[dy * 3 + dx, 0] = valid.reshape(-1).astype(np.float32)
    return A_h, A_w, K_up, masks


# ----------------------- fused kernel: upsample + blur + conv + BN(train) + ReLU -----------

def fused_upsample_block_kernel(x_ref, kup_ref, mask_ref, w_ref, gamma_ref, beta_ref,
                                o_ref, *, N, C_in, C_out, W2, H2W2, eps):
    # x_ref    : (N*C_in, H*W)            bf16
    # kup_ref  : (H*W, H2*W2)             bf16
    # mask_ref : (9, 1, H2*W2)            f32
    # w_ref    : (N*C_out, 9*N*C_in)      bf16  (per-image block-diagonal conv weight)
    # gamma/beta: (C_out, 1)              f32
    # o_ref    : (N*C_out, H2*W2)         f32

    # (1) Upsample + blur for the WHOLE batch: one MXU matmul, M = N*C_in (batch folded).
    ub = jnp.dot(x_ref[...], kup_ref[...], preferred_element_type=jnp.float32)  # (N*C_in, H2W2)

    # (2) 9-tap stack: XLU lane-roll + border mask per tap (center tap: neither).
    #     Kept in f32 (tile-aligned 8-row pieces; also v5e-friendly); ONE bf16 cast of the
    #     whole stack below instead of a cast per tap.
    taps = []
    for dy in range(3):
        for dx in range(3):
            t = dy * 3 + dx
            s = (dy - 1) * W2 + (dx - 1)          # flattened source offset of this tap
            src = ub if s == 0 else pltpu.roll(ub, shift=(-s) % H2W2, axis=1)
            taps.append(src if t == 4 else src * mask_ref[t])
    tap_stack = jnp.concatenate(taps, axis=0).astype(jnp.bfloat16)   # (9*N*C_in, H2W2)

    # (3) Whole-batch 3x3 conv: ONE matmul, contraction depth K = 9*N*C_in.
    z = jnp.dot(w_ref[...], tap_stack, preferred_element_type=jnp.float32)      # (N*C_out, H2W2)

    # (4) Fused training-mode BatchNorm + ReLU (no HBM round trip, no second launch).
    rsum = jnp.sum(z, axis=1, keepdims=True)           # (N*C_out, 1)
    rsq = jnp.sum(z * z, axis=1, keepdims=True)        # (N*C_out, 1)
    csum = jnp.zeros((C_out, 1), jnp.float32)
    csq = jnp.zeros((C_out, 1), jnp.float32)
    for n in range(N):                                 # N is small & static
        csum = csum + rsum[n * C_out:(n + 1) * C_out]
        csq = csq + rsq[n * C_out:(n + 1) * C_out]
    inv_count = 1.0 / float(N * H2W2)
    mean = csum * inv_count
    var = jnp.maximum(csq * inv_count - mean * mean, 0.0)   # clamp: one-pass var can go < 0
    inv_std = jax.lax.rsqrt(var + eps)
    scale = gamma_ref[...] * inv_std                    # (C_out, 1)
    shift = beta_ref[...] - mean * scale                # (C_out, 1)
    scale_b = jnp.concatenate([scale] * N, axis=0)      # (N*C_out, 1); rows are n-major
    shift_b = jnp.concatenate([shift] * N, axis=0)
    o_ref[...] = jnp.maximum(z * scale_b + shift_b, 0.0)


def _vmem_limit_bytes(N, C_in, C_out, HW, H2W2):
    """Size the VMEM budget from the actual buffers (with headroom), capped for v7x."""
    bf, f4 = 2, 4
    inputs = (N * C_in * HW * bf + HW * H2W2 * bf + 9 * H2W2 * f4
              + (N * C_out) * (9 * N * C_in) * bf + 2 * C_out * f4)
    outputs = N * C_out * H2W2 * f4
    temps = (N * C_in * H2W2 * f4               # ub (f32)
             + 10 * N * C_in * H2W2 * f4        # tap pieces + stack
             + 2 * N * C_out * H2W2 * f4)       # z + normalized result
    total = 2 * (inputs + outputs) + temps      # inputs/outputs double-buffered by default
    return int(min(96 * 2**20, max(8 * 2**20, 2 * total)))


# ----------------------- wrapper -----------------------

@jax.jit
def upsample_block_forward(x, w_conv, gamma, beta):
    N, C_in, H, W = x.shape
    C_out = w_conv.shape[0]
    H2, W2 = 2 * H, 2 * W
    HW, H2W2 = H * W, H2 * W2
    eps = 1e-5

    _, _, K_up, masks_np = make_operators(H, W)

    # bf16 MXU operands (f32 accumulation inside the kernel).
    x2 = x.reshape(N * C_in, HW).astype(jnp.bfloat16)
    kup = jnp.asarray(K_up, jnp.bfloat16)
    masks = jnp.asarray(masks_np)                                   # (9, 1, H2W2) f32

    # Per-image block-diagonal conv weight: one MXU contraction of depth 9*N*C_in.
    # w_big[n*C_out+o, t*N*C_in + m*C_in + c] = w_conv[o, c, dy, dx] * (n == m)
    w9 = w_conv.transpose(2, 3, 0, 1).reshape(9, C_out, C_in)        # (9, C_out, C_in)
    eye_n = jnp.eye(N, dtype=w_conv.dtype)
    w_big = jnp.einsum('toc,nm->notmc', w9, eye_n)
    w_big = w_big.reshape(N * C_out, 9 * N * C_in).astype(jnp.bfloat16)

    g2 = gamma.reshape(C_out, 1).astype(jnp.float32)
    b2 = beta.reshape(C_out, 1).astype(jnp.float32)

    kernel = functools.partial(
        fused_upsample_block_kernel,
        N=N, C_in=C_in, C_out=C_out, W2=W2, H2W2=H2W2, eps=eps)

    z = pl.pallas_call(
        kernel,
        out_shape=jax.ShapeDtypeStruct((N * C_out, H2W2), jnp.float32),
        grid=(1,),
        in_specs=[
            pl.BlockSpec((N * C_in, HW), lambda i: (0, 0)),
            pl.BlockSpec((HW, H2W2), lambda i: (0, 0)),
            pl.BlockSpec((9, 1, H2W2), lambda i: (0, 0, 0)),
            pl.BlockSpec((N * C_out, 9 * N * C_in), lambda i: (0, 0)),
            pl.BlockSpec((C_out, 1), lambda i: (0, 0)),
            pl.BlockSpec((C_out, 1), lambda i: (0, 0)),
        ],
        out_specs=pl.BlockSpec((N * C_out, H2W2), lambda i: (0, 0)),
        compiler_params=pltpu.CompilerParams(
            dimension_semantics=("arbitrary",),
            vmem_limit_bytes=_vmem_limit_bytes(N, C_in, C_out, HW, H2W2),
        ),
    )(x2, kup, masks, w_big, g2, b2)

    # TODO(synk): BatchNorm running_mean/running_var buffer updates (stateful) are not modeled.
    return z.reshape(N, C_out, H2, W2)


if __name__ == "__main__":
    N, C_in, C_out, H, W = 2, 4, 8, 16, 16

    key = jax.random.PRNGKey(0)
    kx, kw = jax.random.split(key)
    x = jax.random.normal(kx, (N, C_in, H, W), dtype=jnp.float32)

    # Conv2d weights (kaiming_uniform-like bound), bias=False in the module.
    fan_in = C_in * 3 * 3
    bound = 1.0 / float(np.sqrt(fan_in))
    w_conv = jax.random.uniform(kw, (C_out, C_in, 3, 3), jnp.float32, -bound, bound)

    # BatchNorm affine params at PyTorch init (gamma=1, beta=0).
    gamma = jnp.ones((C_out,), jnp.float32)
    beta = jnp.zeros((C_out,), jnp.float32)

    out = jax.block_until_ready(upsample_block_forward(x, w_conv, gamma, beta))

    # Pure-JAX f32 reference (same linear operators, XLA conv, batch-stat BN, ReLU).
    A_h, A_w, _, _ = make_operators(H, W)
    ub = jnp.einsum('ph,nchw,wq->ncpq', jnp.asarray(A_h), x, jnp.asarray(A_w.T))
    zr = jax.lax.conv_general_dilated(ub, w_conv, (1, 1), ((1, 1), (1, 1)),
                                      dimension_numbers=('NCHW', 'OIHW', 'NCHW'))
    mean = jnp.mean(zr, axis=(0, 2, 3), keepdims=True)
    var = jnp.mean((zr - mean) ** 2, axis=(0, 2, 3), keepdims=True)
    ref = jnp.maximum((zr - mean) * jax.lax.rsqrt(var + 1e-5)
                      * gamma.reshape(1, -1, 1, 1) + beta.reshape(1, -1, 1, 1), 0.0)

    # Tolerance sized for bf16 MXU operands (f32 accumulation) vs the f32 reference.
    np.testing.assert_allclose(np.asarray(out), np.asarray(ref), atol=6e-2, rtol=5e-2)
    print("KERNEL_OK")
</pallas_src>

<mosaic_0001>
module attributes {stable_mosaic.version = 11 : i64} {
  func.func @fused_upsample_block_kernel(%arg0: i32, %arg1: memref<8x256xbf16, #tpu.memory_space<vmem>>, %arg2: memref<256x1024xbf16, #tpu.memory_space<vmem>>, %arg3: memref<9x1x1024xf32, #tpu.memory_space<vmem>>, %arg4: memref<16x72xbf16, #tpu.memory_space<vmem>>, %arg5: memref<8x1xf32, #tpu.memory_space<vmem>>, %arg6: memref<8x1xf32, #tpu.memory_space<vmem>>, %arg7: memref<16x1024xf32, #tpu.memory_space<vmem>>) attributes {dimension_semantics = [#tpu.dimension_semantics<arbitrary>], iteration_bounds = array<i64: 1>, scalar_prefetch = 0 : i64, scratch_operands = 0 : i64, tpu.core_type = #tpu.core_type<tc>, window_params = [{pipeline_mode = #tpu.pipeline_mode<synchronous>, transform_indices = @transform_0, window_bounds = array<i64: 8, 256>}, {pipeline_mode = #tpu.pipeline_mode<synchronous>, transform_indices = @transform_1, window_bounds = array<i64: 256, 1024>}, {pipeline_mode = #tpu.pipeline_mode<synchronous>, transform_indices = @transform_2, window_bounds = array<i64: 9, 1, 1024>}, {pipeline_mode = #tpu.pipeline_mode<synchronous>, transform_indices = @transform_3, window_bounds = array<i64: 16, 72>}, {pipeline_mode = #tpu.pipeline_mode<synchronous>, transform_indices = @transform_4, window_bounds = array<i64: 8, 1>}, {pipeline_mode = #tpu.pipeline_mode<synchronous>, transform_indices = @transform_5, window_bounds = array<i64: 8, 1>}, {pipeline_mode = #tpu.pipeline_mode<synchronous>, transform_indices = @transform_6, window_bounds = array<i64: 16, 1024>}]} {
    %c0 = arith.constant 0 : index
    %c0_0 = arith.constant 0 : index
    %0 = vector.load %arg1[%c0, %c0_0] : memref<8x256xbf16, #tpu.memory_space<vmem>>, vector<8x256xbf16>
    %c0_1 = arith.constant 0 : index
    %c0_2 = arith.constant 0 : index
    %1 = vector.load %arg2[%c0_1, %c0_2] : memref<256x1024xbf16, #tpu.memory_space<vmem>>, vector<256x1024xbf16>
    %cst = arith.constant dense<0.000000e+00> : vector<8x1024xf32>
    %2 = tpu.matmul %0, %1, %cst {dimension_numbers = #tpu.dot_dimension_numbers<[1], [0], [0], [1], [0, 0, 1, 1], [], []>} : vector<8x256xbf16>, vector<256x1024xbf16>, vector<8x1024xf32> -> vector<8x1024xf32>
    %c33_i32 = arith.constant 33 : i32
    %3 = tpu.dynamic_rotate %2 by %c33_i32 dim 1 : vector<8x1024xf32>, i32 -> vector<8x1024xf32>
    %c0_3 = arith.constant 0 : index
    %c0_4 = arith.constant 0 : index
    %c0_5 = arith.constant 0 : index
    %4 = vector.load %arg3[%c0_3, %c0_4, %c0_5] : memref<9x1x1024xf32, #tpu.memory_space<vmem>>, vector<1x1x1024xf32>
    %5 = vector.shape_cast %4 : vector<1x1x1024xf32> to vector<1x1024xf32>
    %6 = vector.broadcast %5 : vector<1x1024xf32> to vector<8x1024xf32>
    %7 = arith.mulf %3, %6 : vector<8x1024xf32>
    %c32_i32 = arith.constant 32 : i32
    %8 = tpu.dynamic_rotate %2 by %c32_i32 dim 1 : vector<8x1024xf32>, i32 -> vector<8x1024xf32>
    %c1 = arith.constant 1 : index
    %c0_6 = arith.constant 0 : index
    %c0_7 = arith.constant 0 : index
    %9 = vector.load %arg3[%c1, %c0_6, %c0_7] : memref<9x1x1024xf32, #tpu.memory_space<vmem>>, vector<1x1x1024xf32>
    %10 = vector.shape_cast %9 : vector<1x1x1024xf32> to vector<1x1024xf32>
    %11 = vector.broadcast %10 : vector<1x1024xf32> to vector<8x1024xf32>
    %12 = arith.mulf %8, %11 : vector<8x1024xf32>
    %c31_i32 = arith.constant 31 : i32
    %13 = tpu.dynamic_rotate %2 by %c31_i32 dim 1 : vector<8x1024xf32>, i32 -> vector<8x1024xf32>
    %c2 = arith.constant 2 : index
    %c0_8 = arith.constant 0 : index
    %c0_9 = arith.constant 0 : index
    %14 = vector.load %arg3[%c2, %c0_8, %c0_9] : memref<9x1x1024xf32, #tpu.memory_space<vmem>>, vector<1x1x1024xf32>
    %15 = vector.shape_cast %14 : vector<1x1x1024xf32> to vector<1x1024xf32>
    %16 = vector.broadcast %15 : vector<1x1024xf32> to vector<8x1024xf32>
    %17 = arith.mulf %13, %16 : vector<8x1024xf32>
    %c1_i32 = arith.constant 1 : i32
    %18 = tpu.dynamic_rotate %2 by %c1_i32 dim 1 : vector<8x1024xf32>, i32 -> vector<8x1024xf32>
    %c3 = arith.constant 3 : index
    %c0_10 = arith.constant 0 : index
    %c0_11 = arith.constant 0 : index
    %19 = vector.load %arg3[%c3, %c0_10, %c0_11] : memref<9x1x1024xf32, #tpu.memory_space<vmem>>, vector<1x1x1024xf32>
    %20 = vector.shape_cast %19 : vector<1x1x1024xf32> to vector<1x1024xf32>
    %21 = vector.broadcast %20 : vector<1x1024xf32> to vector<8x1024xf32>
    %22 = arith.mulf %18, %21 : vector<8x1024xf32>
    %c1023_i32 = arith.constant 1023 : i32
    %23 = tpu.dynamic_rotate %2 by %c1023_i32 dim 1 : vector<8x1024xf32>, i32 -> vector<8x1024xf32>
    %c5 = arith.constant 5 : index
    %c0_12 = arith.constant 0 : index
    %c0_13 = arith.constant 0 : index
    %24 = vector.load %arg3[%c5, %c0_12, %c0_13] : memref<9x1x1024xf32, #tpu.memory_space<vmem>>, vector<1x1x1024xf32>
    %25 = vector.shape_cast %24 : vector<1x1x1024xf32> to vector<1x1024xf32>
    %26 = vector.broadcast %25 : vector<1x1024xf32> to vector<8x1024xf32>
    %27 = arith.mulf %23, %26 : vector<8x1024xf32>
    %c993_i32 = arith.constant 993 : i32
    %28 = tpu.dynamic_rotate %2 by %c993_i32 dim 1 : vector<8x1024xf32>, i32 -> vector<8x1024xf32>
    %c6 = arith.constant 6 : index
    %c0_14 = arith.constant 0 : index
    %c0_15 = arith.constant 0 : index
    %29 = vector.load %arg3[%c6, %c0_14, %c0_15] : memref<9x1x1024xf32, #tpu.memory_space<vmem>>, vector<1x1x1024xf32>
    %30 = vector.shape_cast %29 : vector<1x1x1024xf32> to vector<1x1024xf32>
    %31 = vector.broadcast %30 : vector<1x1024xf32> to vector<8x1024xf32>
    %32 = arith.mulf %28, %31 : vector<8x1024xf32>
    %c992_i32 = arith.constant 992 : i32
    %33 = tpu.dynamic_rotate %2 by %c992_i32 dim 1 : vector<8x1024xf32>, i32 -> vector<8x1024xf32>
    %c7 = arith.constant 7 : index
    %c0_16 = arith.constant 0 : index
    %c0_17 = arith.constant 0 : index
    %34 = vector.load %arg3[%c7, %c0_16, %c0_17] : memref<9x1x1024xf32, #tpu.memory_space<vmem>>, vector<1x1x1024xf32>
    %35 = vector.shape_cast %34 : vector<1x1x1024xf32> to vector<1x1024xf32>
    %36 = vector.broadcast %35 : vector<1x1024xf32> to vector<8x1024xf32>
    %37 = arith.mulf %33, %36 : vector<8x1024xf32>
    %c991_i32 = arith.constant 991 : i32
    %38 = tpu.dynamic_rotate %2 by %c991_i32 dim 1 : vector<8x1024xf32>, i32 -> vector<8x1024xf32>
    %c8 = arith.constant 8 : index
    %c0_18 = arith.constant 0 : index
    %c0_19 = arith.constant 0 : index
    %39 = vector.load %arg3[%c8, %c0_18, %c0_19] : memref<9x1x1024xf32, #tpu.memory_space<vmem>>, vector<1x1x1024xf32>
    %40 = vector.shape_cast %39 : vector<1x1x1024xf32> to vector<1x1024xf32>
    %41 = vector.broadcast %40 : vector<1x1024xf32> to vector<8x1024xf32>
    %42 = arith.mulf %38, %41 : vector<8x1024xf32>
    %43 = tpu.concatenate %7, %12, %17, %22, %2, %27, %32, %37, %42 in 0 : vector<8x1024xf32>, vector<8x1024xf32>, vector<8x1024xf32>, vector<8x1024xf32>, vector<8x1024xf32>, vector<8x1024xf32>, vector<8x1024xf32>, vector<8x1024xf32>, vector<8x1024xf32> -> vector<72x1024xf32>
    %44 = arith.truncf %43 : vector<72x1024xf32> to vector<72x1024xbf16>
    %c0_20 = arith.constant 0 : index
    %c0_21 = arith.constant 0 : index
    %45 = vector.load %arg4[%c0_20, %c0_21] : memref<16x72xbf16, #tpu.memory_space<vmem>>, vector<16x72xbf16>
    %cst_22 = arith.constant dense<0.000000e+00> : vector<16x1024xf32>
    %46 = tpu.matmul %45, %44, %cst_22 {dimension_numbers = #tpu.dot_dimension_numbers<[1], [0], [0], [1], [0, 0, 1, 1], [], []>} : vector<16x72xbf16>, vector<72x1024xbf16>, vector<16x1024xf32> -> vector<16x1024xf32>
    %cst_23 = arith.constant dense<0.000000e+00> : vector<16xf32>
    %47 = vector.multi_reduction <add>, %46, %cst_23 [1] : vector<16x1024xf32> to vector<16xf32>
    %48 = vector.shape_cast %47 : vector<16xf32> to vector<16x1xf32>
    %49 = arith.mulf %46, %46 : vector<16x1024xf32>
    %cst_24 = arith.constant dense<0.000000e+00> : vector<16xf32>
    %50 = vector.multi_reduction <add>, %49, %cst_24 [1] : vector<16x1024xf32> to vector<16xf32>
    %51 = vector.shape_cast %50 : vector<16xf32> to vector<16x1xf32>
    %cst_25 = arith.constant 0.000000e+00 : f32
    %52 = vector.broadcast %cst_25 : f32 to vector<8x1xf32>
    %cst_26 = arith.constant 0.000000e+00 : f32
    %53 = vector.broadcast %cst_26 : f32 to vector<8x1xf32>
    %54 = vector.extract_strided_slice %48 {offsets = [0, 0], sizes = [8, 1], strides = [1, 1]} : vector<16x1xf32> to vector<8x1xf32>
    %55 = arith.addf %52, %54 : vector<8x1xf32>
    %56 = vector.extract_strided_slice %51 {offsets = [0, 0], sizes = [8, 1], strides = [1, 1]} : vector<16x1xf32> to vector<8x1xf32>
    %57 = arith.addf %53, %56 : vector<8x1xf32>
    %58 = vector.extract_strided_slice %48 {offsets = [8, 0], sizes = [8, 1], strides = [1, 1]} : vector<16x1xf32> to vector<8x1xf32>
    %59 = arith.addf %55, %58 : vector<8x1xf32>
    %60 = vector.extract_strided_slice %51 {offsets = [8, 0], sizes = [8, 1], strides = [1, 1]} : vector<16x1xf32> to vector<8x1xf32>
    %61 = arith.addf %57, %60 : vector<8x1xf32>
    %cst_27 = arith.constant 4.8828125E-4 : f32
    %62 = vector.broadcast %cst_27 : f32 to vector<8x1xf32>
    %63 = arith.mulf %59, %62 : vector<8x1xf32>
    %cst_28 = arith.constant 4.8828125E-4 : f32
    %64 = vector.broadcast %cst_28 : f32 to vector<8x1xf32>
    %65 = arith.mulf %61, %64 : vector<8x1xf32>
    %66 = arith.mulf %63, %63 : vector<8x1xf32>
    %67 = arith.subf %65, %66 : vector<8x1xf32>
    %cst_29 = arith.constant 0.000000e+00 : f32
    %68 = vector.broadcast %cst_29 : f32 to vector<8x1xf32>
    %69 = arith.maximumf %67, %68 : vector<8x1xf32>
    %cst_30 = arith.constant 9.99999974E-6 : f32
    %70 = vector.broadcast %cst_30 : f32 to vector<8x1xf32>
    %71 = arith.addf %69, %70 : vector<8x1xf32>
    %72 = math.rsqrt %71 : vector<8x1xf32>
    %c0_31 = arith.constant 0 : index
    %c0_32 = arith.constant 0 : index
    %73 = vector.load %arg5[%c0_31, %c0_32] : memref<8x1xf32, #tpu.memory_space<vmem>>, vector<8x1xf32>
    %74 = arith.mulf %73, %72 : vector<8x1xf32>
    %c0_33 = arith.constant 0 : index
    %c0_34 = arith.constant 0 : index
    %75 = vector.load %arg6[%c0_33, %c0_34] : memref<8x1xf32, #tpu.memory_space<vmem>>, vector<8x1xf32>
    %76 = arith.mulf %63, %74 : vector<8x1xf32>
    %77 = arith.subf %75, %76 : vector<8x1xf32>
    %78 = tpu.concatenate %74, %74 in 0 : vector<8x1xf32>, vector<8x1xf32> -> vector<16x1xf32>
    %79 = tpu.concatenate %77, %77 in 0 : vector<8x1xf32>, vector<8x1xf32> -> vector<16x1xf32>
    %80 = vector.broadcast %78 : vector<16x1xf32> to vector<16x1024xf32>
    %81 = arith.mulf %46, %80 : vector<16x1024xf32>
    %82 = vector.broadcast %79 : vector<16x1xf32> to vector<16x1024xf32>
    %83 = arith.addf %81, %82 : vector<16x1024xf32>
    %cst_35 = arith.constant 0.000000e+00 : f32
    %84 = vector.broadcast %cst_35 : f32 to vector<16x1024xf32>
    %85 = arith.maximumf %83, %84 : vector<16x1024xf32>
    %c0_36 = arith.constant 0 : index
    %c0_37 = arith.constant 0 : index
    %86 = vector.load %arg7[%c0_36, %c0_37] : memref<16x1024xf32, #tpu.memory_space<vmem>>, vector<16x1024xf32>
    tpu.vector_store %arg7[%c0_36, %c0_37], %85 {strides = array<i32>} : memref<16x1024xf32, #tpu.memory_space<vmem>>, vector<16x1024xf32>,
    return
  }
  func.func @transform_0(%arg0: i32) -> (i32, i32) {
    %c0_i32 = arith.constant 0 : i32
    %c0_i32_0 = arith.constant 0 : i32
    %c0_i32_1 = arith.constant 0 : i32
    return %c0_i32, %c0_i32_0 : i32, i32
  }
  func.func @transform_1(%arg0: i32) -> (i32, i32) {
    %c0_i32 = arith.constant 0 : i32
    %c0_i32_0 = arith.constant 0 : i32
    %c0_i32_1 = arith.constant 0 : i32
    return %c0_i32, %c0_i32_0 : i32, i32
  }
  func.func @transform_2(%arg0: i32) -> (i32, i32, i32) {
    %c0_i32 = arith.constant 0 : i32
    %c0_i32_0 = arith.constant 0 : i32
    %c0_i32_1 = arith.constant 0 : i32
    %c0_i32_2 = arith.constant 0 : i32
    return %c0_i32, %c0_i32_0, %c0_i32_1 : i32, i32, i32
  }
  func.func @transform_3(%arg0: i32) -> (i32, i32) {
    %c0_i32 = arith.constant 0 : i32
    %c0_i32_0 = arith.constant 0 : i32
    %c0_i32_1 = arith.constant 0 : i32
    return %c0_i32, %c0_i32_0 : i32, i32
  }
  func.func @transform_4(%arg0: i32) -> (i32, i32) {
    %c0_i32 = arith.constant 0 : i32
    %c0_i32_0 = arith.constant 0 : i32
    %c0_i32_1 = arith.constant 0 : i32
    return %c0_i32, %c0_i32_0 : i32, i32
  }
  func.func @transform_5(%arg0: i32) -> (i32, i32) {
    %c0_i32 = arith.constant 0 : i32
    %c0_i32_0 = arith.constant 0 : i32
    %c0_i32_1 = arith.constant 0 : i32
    return %c0_i32, %c0_i32_0 : i32, i32
  }
  func.func @transform_6(%arg0: i32) -> (i32, i32) {
    %c0_i32 = arith.constant 0 : i32
    %c0_i32_0 = arith.constant 0 : i32
    %c0_i32_1 = arith.constant 0 : i32
    return %c0_i32, %c0_i32_0 : i32, i32
  }
}

</mosaic_0001>

<bundles_post_ra>
// kernel: upsample_block_forward.1
= control target key start
LH: loop header
LB: loop body
LE: loop exit
PB: predicated region body
PF: predicated region fallthrough
CT: control target
= control target key end

     0   :  { %11 = vsyncpa [#allocation3], 0  ;;  %s2168_s21 = smov [#allocation2]   ;;  %s3058_s0 = inlined_call_operand.vmem [shape: bf16[8,256], index: 0, kind: input, shape index: {}]   ;;  %s3059_s1 = inlined_call_operand.hbm [shape: bf16[256,1024], index: 1, kind: input, shape index: {}]   ;;  %s3060_s2 = inlined_call_operand.vmem [shape: f32[9,1,1024], index: 2, kind: input, shape index: {}]   ;;  %s3061_s3 = inlined_call_operand.vmem [shape: bf16[16,72], index: 3, kind: input, shape index: {}]   ;;  %s3062_s4 = inlined_call_operand.vmem [shape: f32[8,1], index: 4, kind: input, shape index: {}]   ;;  %s3063_s5 = inlined_call_operand.vmem [shape: f32[8,1], index: 5, kind: input, shape index: {}]   ;;  %s3064_s6 = inlined_call_operand.vmem [shape: f32[16,1024], index: 6, kind: output, shape index: {}]  }
   0x1   :  { %s19_s22 = sshll.u32 %s2168_s21, 4  ;;  %s20_s22 = int_to_ptr.vmem [resolvable:$true] %s19_s22 }
   0x2   :  { %s2154_s23 = scalar_lea.vmem %s20_s22, 16384  ;;  %p2159_p1 = scmp.lt.s32.totalorder %s20_s22, %s20_s22 }
   0x3   :  { %p2155_p0 = scmp.ne.s32.totalorder %s20_s22, %s2154_s23  ;;  %p2160_p2 = scmp.lt.s32.totalorder %s2154_s23, %s2154_s23 }
   0x5   :  { %p2161_p3 = por %p2160_p2, %p2159_p1 }
   0x7   :  { %p2162_p4 = pnand %p2161_p3, %p2155_p0 }
   0x9   :  { %2165 = shalt.err (!%p2162_p4)
}
   0xa   :  { %s2169_s24 = smov 512   ;;  %s2170_s25 = smov 32  }
   0xb   :  { %25 = dma.hbm_to_vmem [thread:$0]  %s3059_s1, 16384, %s20_s22, [#allocation3], %s2169_s24, %s2169_s24, %s2170_s25  }
   0xc   :  { %2166 = dma.done.wait [#allocation3], 16384  }
   0xd   :  { %2167 = vsyncadd [#allocation3], 4294950912  ;;  %v95_v0 = vld [vmem:[#allocation2 + $0x1c0] sm:$0xff]  ;;  %v96_v2 = vld [vmem:[#allocation2 + $0x1c8] sm:$0xff]  ;;  %s2172_s29 = smov 97   ;;  %s2173_s30 = smov 96  }
   0xe   :  { %v99_v1 = vld [vmem:[#allocation2 + $0x1e0] sm:$0xff]  ;;  %v100_v4 = vld [vmem:[#allocation2 + $0x1e8] sm:$0xff]  ;;  %s2174_s7 = smov 127   ;;  %s2175_s8 = smov 31   ;;  %vm1638_vm6 = vcmask 1043456   ;;  %vm1634_vm9 = vcmask 588800  }
   0xf   :  { %v2041_v3 = vcombine.high %v95_v0, %v99_v1  ;;  %v2040_v5 = vcombine.low %v95_v0, %v99_v1  ;;  %v87_v6 = vld [vmem:[#allocation2 + $0x180] sm:$0xff]  ;;  %v2043_v8 = vcombine.high %v96_v2, %v100_v4  ;;  %v2042_v9 = vcombine.low %v96_v2, %v100_v4  ;;  %v88_v11 = vld [vmem:[#allocation2 + $0x188] sm:$0xff]  ;;  %s2176_s9 = smov 1   ;;  %s2177_s10 = smov 33  }
  0x10   :  { %v91_v7 = vld [vmem:[#allocation2 + $0x1a0] sm:$0xff]  ;;  %v92_v12 = vld [vmem:[#allocation2 + $0x1a8] sm:$0xff] }
  0x11   :  { %v2033_v10 = vcombine.high %v87_v6, %v91_v7  ;;  %v79_v13 = vld [vmem:[#allocation2 + $0x140] sm:$0xff]  ;;  %814 = vmatprep.subr.bf16.mxu0 %v2041_v3  ;;  %v2035_v14 = vcombine.high %v88_v11, %v92_v12  ;;  %v80_v16 = vld [vmem:[#allocation2 + $0x148] sm:$0xff]  ;;  %855 = vmatprep.subr.bf16.mxu1 %v2043_v8  ;;  %v2032_v18 = vcombine.low %v87_v6, %v91_v7 }
  0x12   :  { %v83_v15 = vld [vmem:[#allocation2 + $0x160] sm:$0xff]  ;;  %v84_v17 = vld [vmem:[#allocation2 + $0x168] sm:$0xff]  ;;  %815 = vmatpush1.bf16.msra.mxu0 %v2040_v5  ;;  %856 = vmatpush1.bf16.msra.mxu1 %v2042_v9  ;;  %v2034_v19 = vcombine.low %v88_v11, %v92_v12 }
  0x13   :  { %816 = vmatprep.subr.bf16.mxu0 %v2033_v10  ;;  %v2025_v20 = vcombine.high %v79_v13, %v83_v15  ;;  %857 = vmatprep.subr.bf16.mxu1 %v2035_v14  ;;  %v2027_v21 = vcombine.high %v80_v16, %v84_v17  ;;  %v71_v22 = vld [vmem:[#allocation2 + $0x100] sm:$0xff]  ;;  %v72_v24 = vld [vmem:[#allocation2 + $0x108] sm:$0xff]  ;;  %v2024_v26 = vcombine.low %v79_v13, %v83_v15 }
  0x14   :  { %v75_v23 = vld [vmem:[#allocation2 + $0x120] sm:$0xff]  ;;  %v76_v25 = vld [vmem:[#allocation2 + $0x128] sm:$0xff]  ;;  %v2026_v27 = vcombine.low %v80_v16, %v84_v17 }
  0x15   :  { %v2017_v28 = vcombine.high %v71_v22, %v75_v23  ;;  %v2019_v29 = vcombine.high %v72_v24, %v76_v25  ;;  %v63_v30 = vld [vmem:[#allocation2 + $0xc0] sm:$0xff]  ;;  %v64_v32 = vld [vmem:[#allocation2 + $0xc8] sm:$0xff]  ;;  %v2016_v34 = vcombine.low %v71_v22, %v75_v23  ;;  %v2018_v35 = vcombine.low %v72_v24, %v76_v25 }
  0x16   :  { %817 = vmatpush1.bf16.msra.mxu0 %v2032_v18  ;;  %858 = vmatpush1.bf16.msra.mxu1 %v2034_v19  ;;  %v67_v31 = vld [vmem:[#allocation2 + $0xe0] sm:$0xff]  ;;  %v68_v33 = vld [vmem:[#allocation2 + $0xe8] sm:$0xff] }
  0x17   :  { %818 = vmatprep.subr.bf16.mxu0 %v2025_v20  ;;  %859 = vmatprep.subr.bf16.mxu1 %v2027_v21  ;;  %v2009_v36 = vcombine.high %v63_v30, %v67_v31  ;;  %v2011_v37 = vcombine.high %v64_v32, %v68_v33  ;;  %v55_v38 = vld [vmem:[#allocation2 + $0x80] sm:$0xff]  ;;  %v56_v40 = vld [vmem:[#allocation2 + $0x88] sm:$0xff]  ;;  %v2008_v42 = vcombine.low %v63_v30, %v67_v31 }
  0x18   :  { %v59_v39 = vld [vmem:[#allocation2 + $0xa0] sm:$0xff]  ;;  %v60_v41 = vld [vmem:[#allocation2 + $0xa8] sm:$0xff]  ;;  %v2010_v43 = vcombine.low %v64_v32, %v68_v33 }
  0x19   :  { %v2001_v44 = vcombine.high %v55_v38, %v59_v39  ;;  %v2003_v45 = vcombine.high %v56_v40, %v60_v41  ;;  %v47_v46 = vld [vmem:[#allocation2 + $0x40] sm:$0xff]  ;;  %v48_v48 = vld [vmem:[#allocation2 + $0x48] sm:$0xff]  ;;  %v2000_v50 = vcombine.low %v55_v38, %v59_v39  ;;  %v2002_v51 = vcombine.low %v56_v40, %v60_v41 }
  0x1a   :  { %819 = vmatpush1.bf16.msra.mxu0 %v2024_v26  ;;  %860 = vmatpush1.bf16.msra.mxu1 %v2026_v27  ;;  %v51_v47 = vld [vmem:[#allocation2 + $0x60] sm:$0xff]  ;;  %v52_v49 = vld [vmem:[#allocation2 + $0x68] sm:$0xff] }
  0x1b   :  { %820 = vmatprep.subr.bf16.mxu0 %v2017_v28  ;;  %861 = vmatprep.subr.bf16.mxu1 %v2019_v29  ;;  %v1993_v52 = vcombine.high %v47_v46, %v51_v47  ;;  %v2221_v53 = vld [vmem:[%s3058_s0] sm:$0xff]  ;;  %v1995_v54 = vcombine.high %v48_v48, %v52_v49  ;;  %v40_v58 = vld [vmem:[#allocation2 + $0x8] sm:$0xff]  ;;  %v1992_v60 = vcombine.low %v47_v46, %v51_v47  ;;  %s2171_s0 = smov 95  }
  0x1c   :  { %v39_v55 = vld [vmem:[#allocation2] sm:$0xff]  ;;  %v2225_v57 = vcombine.high %v2221_v53, %v2221_v53  ;;  %v44_v59 = vld [vmem:[#allocation2 + $0x28] sm:$0xff]  ;;  %v1994_v61 = vcombine.low %v48_v48, %v52_v49 }
  0x1d   :  { %v43_v56 = vld [vmem:[#allocation2 + $0x20] sm:$0xff]  ;;  %v1987_v63 = vcombine.high %v40_v58, %v44_v59  ;;  %v160_v2 = vld [vmem:[#allocation2 + $0x3c8] sm:$0xff]  ;;  %v1986_v5 = vcombine.low %v40_v58, %v44_v59 }
  0x1e   :  { %821 = vmatpush1.bf16.msra.mxu0 %v2016_v34  ;;  %862 = vmatpush1.bf16.msra.mxu1 %v2018_v35  ;;  %v1985_v62 = vcombine.high %v39_v55, %v43_v56  ;;  %v159_v0 = vld [vmem:[#allocation2 + $0x3c0] sm:$0xff]  ;;  %v164_v3 = vld [vmem:[#allocation2 + $0x3e8] sm:$0xff]  ;;  %v1984_v4 = vcombine.low %v39_v55, %v43_v56 }
  0x1f   :  { %822 = vmatprep.subr.bf16.mxu0 %v2009_v36  ;;  %863 = vmatprep.subr.bf16.mxu1 %v2011_v37  ;;  %v163_v1 = vld [vmem:[#allocation2 + $0x3e0] sm:$0xff]  ;;  %v2107_v7 = vcombine.high %v160_v2, %v164_v3  ;;  %v152_v10 = vld [vmem:[#allocation2 + $0x388] sm:$0xff]  ;;  %v2106_v13 = vcombine.low %v160_v2, %v164_v3  ;;  %v97_v2 = vld [vmem:[#allocation2 + $0x1d0] sm:$0xff] }
  0x20   :  { %846 = vmatprep.mubr.bf16.mxu0 %v2225_v57  ;;  %887 = vmatprep.mubr.bf16.mxu1 %v2225_v57  ;;  %v2105_v6 = vcombine.high %v159_v0, %v163_v1  ;;  %v151_v8 = vld [vmem:[#allocation2 + $0x380] sm:$0xff]  ;;  %v156_v11 = vld [vmem:[#allocation2 + $0x3a8] sm:$0xff]  ;;  %v2104_v12 = vcombine.low %v159_v0, %v163_v1  ;;  %v101_v3 = vld [vmem:[#allocation2 + $0x1f0] sm:$0xff] }
  0x21   :  { %v155_v9 = vld [vmem:[#allocation2 + $0x3a0] sm:$0xff]  ;;  %v2099_v15 = vcombine.high %v152_v10, %v156_v11  ;;  %v144_v18 = vld [vmem:[#allocation2 + $0x348] sm:$0xff]  ;;  %v2098_v21 = vcombine.low %v152_v10, %v156_v11  ;;  %v93_v10 = vld [vmem:[#allocation2 + $0x1b0] sm:$0xff] }
  0x22   :  { %823 = vmatpush1.bf16.msra.mxu0 %v2008_v42  ;;  %864 = vmatpush1.bf16.msra.mxu1 %v2010_v43  ;;  %v2097_v14 = vcombine.high %v151_v8, %v155_v9  ;;  %v143_v16 = vld [vmem:[#allocation2 + $0x340] sm:$0xff]  ;;  %v148_v19 = vld [vmem:[#allocation2 + $0x368] sm:$0xff]  ;;  %v2096_v20 = vcombine.low %v151_v8, %v155_v9  ;;  %v2045_v8 = vcombine.high %v97_v2, %v101_v3  ;;  %v89_v9 = vld [vmem:[#allocation2 + $0x190] sm:$0xff] }
  0x23   :  { %824 = vmatprep.subr.bf16.mxu0 %v2001_v44  ;;  %865 = vmatprep.subr.bf16.mxu1 %v2003_v45  ;;  %v147_v17 = vld [vmem:[#allocation2 + $0x360] sm:$0xff]  ;;  %v2091_v23 = vcombine.high %v144_v18, %v148_v19  ;;  %v136_v26 = vld [vmem:[#allocation2 + $0x308] sm:$0xff]  ;;  %v2090_v29 = vcombine.low %v144_v18, %v148_v19  ;;  %v81_v18 = vld [vmem:[#allocation2 + $0x150] sm:$0xff] }
  0x24   :  { %v2089_v22 = vcombine.high %v143_v16, %v147_v17  ;;  %v135_v24 = vld [vmem:[#allocation2 + $0x300] sm:$0xff]  ;;  %v140_v27 = vld [vmem:[#allocation2 + $0x328] sm:$0xff]  ;;  %v2088_v28 = vcombine.low %v143_v16, %v147_v17  ;;  %v2037_v16 = vcombine.high %v89_v9, %v93_v10  ;;  %v85_v19 = vld [vmem:[#allocation2 + $0x170] sm:$0xff] }
  0x25   :  { %v139_v25 = vld [vmem:[#allocation2 + $0x320] sm:$0xff]  ;;  %v2083_v31 = vcombine.high %v136_v26, %v140_v27  ;;  %v128_v34 = vld [vmem:[#allocation2 + $0x2c8] sm:$0xff]  ;;  %v2082_v37 = vcombine.low %v136_v26, %v140_v27  ;;  %v77_v26 = vld [vmem:[#allocation2 + $0x130] sm:$0xff] }
  0x26   :  { %825 = vmatpush1.bf16.msra.mxu0 %v2000_v50  ;;  %866 = vmatpush1.bf16.msra.mxu1 %v2002_v51  ;;  %v2081_v30 = vcombine.high %v135_v24, %v139_v25  ;;  %v127_v32 = vld [vmem:[#allocation2 + $0x2c0] sm:$0xff]  ;;  %v132_v35 = vld [vmem:[#allocation2 + $0x2e8] sm:$0xff]  ;;  %v2080_v36 = vcombine.low %v135_v24, %v139_v25  ;;  %v73_v25 = vld [vmem:[#allocation2 + $0x110] sm:$0xff] }
  0x27   :  { %826 = vmatprep.subr.bf16.mxu0 %v1993_v52  ;;  %867 = vmatprep.subr.bf16.mxu1 %v1995_v54  ;;  %v131_v33 = vld [vmem:[#allocation2 + $0x2e0] sm:$0xff]  ;;  %v2075_v39 = vcombine.high %v128_v34, %v132_v35  ;;  %v120_v42 = vld [vmem:[#allocation2 + $0x288] sm:$0xff]  ;;  %v2074_v45 = vcombine.low %v128_v34, %v132_v35  ;;  %v69_v34 = vld [vmem:[#allocation2 + $0xf0] sm:$0xff] }
  0x28   :  { %v2073_v38 = vcombine.high %v127_v32, %v131_v33  ;;  %v119_v40 = vld [vmem:[#allocation2 + $0x280] sm:$0xff]  ;;  %v124_v43 = vld [vmem:[#allocation2 + $0x2a8] sm:$0xff]  ;;  %v2072_v44 = vcombine.low %v127_v32, %v131_v33  ;;  %v65_v33 = vld [vmem:[#allocation2 + $0xd0] sm:$0xff] }
  0x29   :  { %v123_v41 = vld [vmem:[#allocation2 + $0x2a0] sm:$0xff]  ;;  %v2067_v47 = vcombine.high %v120_v42, %v124_v43  ;;  %v112_v50 = vld [vmem:[#allocation2 + $0x248] sm:$0xff]  ;;  %v2066_v54 = vcombine.low %v120_v42, %v124_v43  ;;  %v58_v43 = vld [vmem:[#allocation2 + $0x98] sm:$0xff] }
  0x2a   :  { %827 = vmatpush1.bf16.msra.mxu0 %v1992_v60  ;;  %868 = vmatpush1.bf16.msra.mxu1 %v1994_v61  ;;  %v2065_v46 = vcombine.high %v119_v40, %v123_v41  ;;  %v111_v48 = vld [vmem:[#allocation2 + $0x240] sm:$0xff]  ;;  %v116_v51 = vld [vmem:[#allocation2 + $0x268] sm:$0xff]  ;;  %v2064_v52 = vcombine.low %v119_v40, %v123_v41  ;;  %v61_v41 = vld [vmem:[#allocation2 + $0xb0] sm:$0xff] }
  0x2b   :  { %828 = vmatprep.subr.bf16.mxu0 %v1985_v62  ;;  %869 = vmatprep.subr.bf16.mxu1 %v1987_v63  ;;  %v115_v49 = vld [vmem:[#allocation2 + $0x260] sm:$0xff]  ;;  %v2059_v56 = vcombine.high %v112_v50, %v116_v51  ;;  %v104_v60 = vld [vmem:[#allocation2 + $0x208] sm:$0xff]  ;;  %v2058_v63 = vcombine.low %v112_v50, %v116_v51  ;;  %v50_v51 = vld [vmem:[#allocation2 + $0x58] sm:$0xff] }
  0x2c   :  { %v2057_v55 = vcombine.high %v111_v48, %v115_v49  ;;  %v103_v58 = vld [vmem:[#allocation2 + $0x200] sm:$0xff]  ;;  %v108_v61 = vld [vmem:[#allocation2 + $0x228] sm:$0xff]  ;;  %v2056_v62 = vcombine.low %v111_v48, %v115_v49  ;;  %v49_v48 = vld [vmem:[#allocation2 + $0x50] sm:$0xff] }
  0x2d   :  { %v107_v59 = vld [vmem:[#allocation2 + $0x220] sm:$0xff]  ;;  %v2051_v1 = vcombine.high %v104_v60, %v108_v61  ;;  %v53_v49 = vld [vmem:[#allocation2 + $0x70] sm:$0xff] }
  0x2e   :  { %829 = vmatpush1.bf16.msra.mxu0 %v1984_v4  ;;  %870 = vmatpush1.bf16.msra.mxu1 %v1986_v5  ;;  %v2049_v0 = vcombine.high %v103_v58, %v107_v59  ;;  %v98_v4 = vld [vmem:[#allocation2 + $0x1d8] sm:$0xff] }
  0x2f   :  { %830 = vmatprep.subr.bf16.mxu0 %v2105_v6  ;;  %871 = vmatprep.subr.bf16.mxu1 %v2107_v7  ;;  %v102_v5 = vld [vmem:[#allocation2 + $0x1f8] sm:$0xff]  ;;  %v2048_v6 = vcombine.low %v103_v58, %v107_v59  ;;  %v2050_v7 = vcombine.low %v104_v60, %v108_v61  ;;  %v41_v58 = vld [vmem:[#allocation2 + $0x10] sm:$0xff] }
  0x30   :  { %v2047_v11 = vcombine.high %v98_v4, %v102_v5  ;;  %v2046_v17 = vcombine.low %v98_v4, %v102_v5  ;;  %v45_v59 = vld [vmem:[#allocation2 + $0x30] sm:$0xff]  ;;  %v42_v61 = vld [vmem:[#allocation2 + $0x18] sm:$0xff] }
  0x31   :  { %v162_v5 = vld [vmem:[#allocation2 + $0x3d8] sm:$0xff] }
  0x32   :  { %831 = vmatpush2.bf16.msra.mxu0 %v2104_v12  ;;  %872 = vmatpush2.bf16.msra.mxu1 %v2106_v13  ;;  %v2231_v12 = vcombine.low %v2221_v53, %v2221_v53  ;;  %v90_v13 = vld [vmem:[#allocation2 + $0x198] sm:$0xff]  ;;  %v2036_v53 = vcombine.low %v89_v9, %v93_v10  ;;  %v153_v10 = vld [vmem:[#allocation2 + $0x390] sm:$0xff] }
  0x33   :  { %832 = vmatprep.subr.bf16.mxu0 %v2097_v14  ;;  %873 = vmatprep.subr.bf16.mxu1 %v2099_v15  ;;  %v94_v14 = vld [vmem:[#allocation2 + $0x1b8] sm:$0xff]  ;;  %v2044_v15 = vcombine.low %v97_v2, %v101_v3  ;;  %v161_v2 = vld [vmem:[#allocation2 + $0x3d0] sm:$0xff] }
  0x34   :  { %v2038_v24 = vcombine.low %v90_v13, %v94_v14  ;;  %v165_v3 = vld [vmem:[#allocation2 + $0x3f0] sm:$0xff] }
  0x36   :  { %833 = vmatpush2.bf16.msra.mxu0 %v2096_v20  ;;  %874 = vmatpush2.bf16.msra.mxu1 %v2098_v21  ;;  %v2039_v20 = vcombine.high %v90_v13, %v94_v14  ;;  %v82_v21 = vld [vmem:[#allocation2 + $0x158] sm:$0xff] }
  0x37   :  { %834 = vmatprep.subr.bf16.mxu0 %v2089_v22  ;;  %875 = vmatprep.subr.bf16.mxu1 %v2091_v23  ;;  %v86_v22 = vld [vmem:[#allocation2 + $0x178] sm:$0xff]  ;;  %v2029_v23 = vcombine.high %v81_v18, %v85_v19 }
  0x38   :  { %v2031_v27 = vcombine.high %v82_v21, %v86_v22  ;;  %v2030_v32 = vcombine.low %v82_v21, %v86_v22  ;;  %v154_v14 = vld [vmem:[#allocation2 + $0x398] sm:$0xff] }
  0x39   :  { %v146_v22 = vld [vmem:[#allocation2 + $0x358] sm:$0xff] }
  0x3a   :  { %835 = vmatpush2.bf16.msra.mxu0 %v2088_v28  ;;  %876 = vmatpush2.bf16.msra.mxu1 %v2090_v29  ;;  %v74_v28 = vld [vmem:[#allocation2 + $0x118] sm:$0xff] }
  0x3b   :  { %836 = vmatprep.subr.bf16.mxu0 %v2081_v30  ;;  %877 = vmatprep.subr.bf16.mxu1 %v2083_v31  ;;  %v78_v29 = vld [vmem:[#allocation2 + $0x138] sm:$0xff]  ;;  %v2028_v30 = vcombine.low %v81_v18, %v85_v19  ;;  %v2021_v31 = vcombine.high %v73_v25, %v77_v26  ;;  %v145_v19 = vld [vmem:[#allocation2 + $0x350] sm:$0xff] }
  0x3c   :  { %v2023_v35 = vcombine.high %v74_v28, %v78_v29  ;;  %v2022_v40 = vcombine.low %v74_v28, %v78_v29  ;;  %v138_v29 = vld [vmem:[#allocation2 + $0x318] sm:$0xff] }
  0x3e   :  { %837 = vmatpush2.bf16.msra.mxu0 %v2080_v36  ;;  %878 = vmatpush2.bf16.msra.mxu1 %v2082_v37  ;;  %v66_v36 = vld [vmem:[#allocation2 + $0xd8] sm:$0xff] }
  0x3f   :  { %838 = vmatprep.subr.bf16.mxu0 %v2073_v38  ;;  %879 = vmatprep.subr.bf16.mxu1 %v2075_v39  ;;  %v70_v37 = vld [vmem:[#allocation2 + $0xf8] sm:$0xff]  ;;  %v2020_v38 = vcombine.low %v73_v25, %v77_v26  ;;  %v2013_v39 = vcombine.high %v65_v33, %v69_v34  ;;  %v137_v26 = vld [vmem:[#allocation2 + $0x310] sm:$0xff] }
  0x40   :  { %v2015_v42 = vcombine.high %v66_v36, %v70_v37 }
  0x42   :  { %839 = vmatpush2.bf16.msra.mxu0 %v2072_v44  ;;  %880 = vmatpush2.bf16.msra.mxu1 %v2074_v45  ;;  %v62_v44 = vld [vmem:[#allocation2 + $0xb8] sm:$0xff]  ;;  %v2012_v45 = vcombine.low %v65_v33, %v69_v34  ;;  %v129_v34 = vld [vmem:[#allocation2 + $0x2d0] sm:$0xff] }
  0x43   :  { %840 = vmatprep.subr.bf16.mxu0 %v2065_v46  ;;  %881 = vmatprep.subr.bf16.mxu1 %v2067_v47  ;;  %v2014_v47 = vcombine.low %v66_v36, %v70_v37  ;;  %v2007_v50 = vcombine.high %v58_v43, %v62_v44  ;;  %v130_v37 = vld [vmem:[#allocation2 + $0x2d8] sm:$0xff] }
  0x46   :  { %841 = vmatpush2.bf16.msra.mxu0 %v2064_v52  ;;  %882 = vmatpush2.bf16.msra.mxu1 %v2066_v54  ;;  %v54_v52 = vld [vmem:[#allocation2 + $0x78] sm:$0xff] }
  0x47   :  { %842 = vmatprep.subr.bf16.mxu0 %v2057_v55  ;;  %883 = vmatprep.subr.bf16.mxu1 %v2059_v56  ;;  %v1997_v55 = vcombine.high %v49_v48, %v53_v49  ;;  %v2006_v56 = vcombine.low %v58_v43, %v62_v44  ;;  %v1999_v60 = vcombine.high %v50_v51, %v54_v52  ;;  %v122_v44 = vld [vmem:[#allocation2 + $0x298] sm:$0xff] }
  0x4a   :  { %843 = vmatpush2.bf16.msra.mxu0 %v2056_v62  ;;  %884 = vmatpush2.bf16.msra.mxu1 %v2058_v63  ;;  %v46_v62 = vld [vmem:[#allocation2 + $0x38] sm:$0xff]  ;;  %v1996_v63 = vcombine.low %v49_v48, %v53_v49  ;;  %v113_v49 = vld [vmem:[#allocation2 + $0x250] sm:$0xff] }
  0x4b   :  { %844 = vmatprep.subr.bf16.mxu0 %v2049_v0  ;;  %885 = vmatprep.subr.bf16.mxu1 %v2051_v1  ;;  %v1989_v0 = vcombine.high %v41_v58, %v45_v59  ;;  %v1998_v1 = vcombine.low %v50_v51, %v54_v52  ;;  %v1991_v4 = vcombine.high %v42_v61, %v46_v62  ;;  %v114_v52 = vld [vmem:[#allocation2 + $0x258] sm:$0xff] }
  0x4c   :  { %v1990_v9 = vcombine.low %v42_v61, %v46_v62  ;;  %v106_v62 = vld [vmem:[#allocation2 + $0x218] sm:$0xff] }
  0x4e   :  { %845 = vmatpush2.bf16.msra.mxu0 %v2048_v6  ;;  %886 = vmatpush2.bf16.msra.mxu1 %v2050_v7  ;;  %v166_v6 = vld [vmem:[#allocation2 + $0x3f8] sm:$0xff]  ;;  %v1988_v7 = vcombine.low %v41_v58, %v45_v59  ;;  %v105_v59 = vld [vmem:[#allocation2 + $0x210] sm:$0xff] }
  0x4f   :  { %896 = vmatprep.subr.bf16.mxu0 %v2045_v8  ;;  %937 = vmatprep.subr.bf16.mxu1 %v2047_v11  ;;  %v2109_v8 = vcombine.high %v161_v2, %v165_v3  ;;  %v157_v11 = vld [vmem:[#allocation2 + $0x3b0] sm:$0xff]  ;;  %v2111_v13 = vcombine.high %v162_v5, %v166_v6  ;;  %v2110_v18 = vcombine.low %v162_v5, %v166_v6 }
  0x51   :  { %847 = vmatmul.mubr.bf16.vlgmr.msra.gmra.mxu0 %v2231_v12  ;;  %888 = vmatmul.mubr.bf16.vlgmr.msra.gmra.mxu1 %v2231_v12 }
  0x52   :  { %897 = vmatpush1.bf16.msra.mxu0 %v2044_v15  ;;  %938 = vmatpush1.bf16.msra.mxu1 %v2046_v17  ;;  %v158_v15 = vld [vmem:[#allocation2 + $0x3b8] sm:$0xff]  ;;  %v2101_v17 = vcombine.high %v153_v10, %v157_v11 }
  0x53   :  { %898 = vmatprep.subr.bf16.mxu0 %v2037_v16  ;;  %939 = vmatprep.subr.bf16.mxu1 %v2039_v20  ;;  %v2108_v16 = vcombine.low %v161_v2, %v165_v3  ;;  %v149_v20 = vld [vmem:[#allocation2 + $0x370] sm:$0xff]  ;;  %v2103_v21 = vcombine.high %v154_v14, %v158_v15  ;;  %v2102_v25 = vcombine.low %v154_v14, %v158_v15 }
  0x54   :  { %928 = vmatprep.mubr.bf16.mxu0 %v2225_v57  ;;  %969 = vmatprep.mubr.bf16.mxu1 %v2225_v57  ;;  %v57_v57 = vld [vmem:[#allocation2 + $0x90] sm:$0xff] }
  0x55   :  { %v2005_v46 = vcombine.high %v57_v57, %v61_v41  ;;  %v2004_v54 = vcombine.low %v57_v57, %v61_v41  ;;  %v121_v41 = vld [vmem:[#allocation2 + $0x290] sm:$0xff] }
  0x56   :  { %899 = vmatpush1.bf16.msra.mxu0 %v2036_v53  ;;  %940 = vmatpush1.bf16.msra.mxu1 %v2038_v24  ;;  %v150_v53 = vld [vmem:[#allocation2 + $0x378] sm:$0xff]  ;;  %v2093_v24 = vcombine.high %v145_v19, %v149_v20 }
  0x57   :  { %900 = vmatprep.subr.bf16.mxu0 %v2029_v23  ;;  %941 = vmatprep.subr.bf16.mxu1 %v2031_v27  ;;  %v2100_v23 = vcombine.low %v153_v10, %v157_v11  ;;  %v141_v27 = vld [vmem:[#allocation2 + $0x330] sm:$0xff]  ;;  %v2095_v28 = vcombine.high %v146_v22, %v150_v53  ;;  %v2094_v33 = vcombine.low %v146_v22, %v150_v53  ;;  %v3065_v22 = vmov 0  }
  0x58   :  { %2139 = vset.pattern.permute.xlu1 %v3065_v22  ;;  %2140 = vset.pattern.permute.xlu0 %v3065_v22 }
  0x5a   :  { %901 = vmatpush1.bf16.msra.mxu0 %v2028_v30  ;;  %942 = vmatpush1.bf16.msra.mxu1 %v2030_v32  ;;  %v142_v30 = vld [vmem:[#allocation2 + $0x338] sm:$0xff]  ;;  %v2085_v32 = vcombine.high %v137_v26, %v141_v27 }
  0x5b   :  { %902 = vmatprep.subr.bf16.mxu0 %v2021_v31  ;;  %943 = vmatprep.subr.bf16.mxu1 %v2023_v35  ;;  %v2092_v31 = vcombine.low %v145_v19, %v149_v20  ;;  %v133_v35 = vld [vmem:[#allocation2 + $0x2f0] sm:$0xff]  ;;  %v2087_v36 = vcombine.high %v138_v29, %v142_v30  ;;  %v2086_v57 = vcombine.low %v138_v29, %v142_v30 }
  0x5e   :  { %903 = vmatpush1.bf16.msra.mxu0 %v2020_v38  ;;  %944 = vmatpush1.bf16.msra.mxu1 %v2022_v40  ;;  %v134_v38 = vld [vmem:[#allocation2 + $0x2f8] sm:$0xff]  ;;  %v2077_v40 = vcombine.high %v129_v34, %v133_v35 }
  0x5f   :  { %904 = vmatprep.subr.bf16.mxu0 %v2013_v39  ;;  %945 = vmatprep.subr.bf16.mxu1 %v2015_v42  ;;  %v2084_v39 = vcombine.low %v137_v26, %v141_v27  ;;  %v125_v42 = vld [vmem:[#allocation2 + $0x2b0] sm:$0xff]  ;;  %v2079_v43 = vcombine.high %v130_v37, %v134_v38  ;;  %v2078_v48 = vcombine.low %v130_v37, %v134_v38 }
  0x62   :  { %905 = vmatpush1.bf16.msra.mxu0 %v2012_v45  ;;  %946 = vmatpush1.bf16.msra.mxu1 %v2014_v47  ;;  %v126_v45 = vld [vmem:[#allocation2 + $0x2b8] sm:$0xff]  ;;  %v2069_v47 = vcombine.high %v121_v41, %v125_v42 }
  0x63   :  { %906 = vmatprep.subr.bf16.mxu0 %v2005_v46  ;;  %947 = vmatprep.subr.bf16.mxu1 %v2007_v50  ;;  %v2076_v46 = vcombine.low %v129_v34, %v133_v35  ;;  %v117_v50 = vld [vmem:[#allocation2 + $0x270] sm:$0xff]  ;;  %v2071_v51 = vcombine.high %v122_v44, %v126_v45  ;;  %v2070_v58 = vcombine.low %v122_v44, %v126_v45  ;;  %v994_v34 = vlaneseq }
  0x65   :  { %v2409_v37 = vand.u32 127, %v994_v34  ;;  %v2411_v38 = vshrl.u32 %v994_v34, 7 }
  0x66   :  { %907 = vmatpush1.bf16.msra.mxu0 %v2004_v54  ;;  %948 = vmatpush1.bf16.msra.mxu1 %v2006_v56  ;;  %v118_v54 = vld [vmem:[#allocation2 + $0x278] sm:$0xff]  ;;  %v2061_v56 = vcombine.high %v113_v49, %v117_v50 }
  0x67   :  { %908 = vmatprep.subr.bf16.mxu0 %v1997_v55  ;;  %949 = vmatprep.subr.bf16.mxu1 %v1999_v60  ;;  %v2068_v55 = vcombine.low %v121_v41, %v125_v42  ;;  %v109_v60 = vld [vmem:[#allocation2 + $0x230] sm:$0xff]  ;;  %v2063_v61 = vcombine.high %v114_v52, %v118_v54  ;;  %v2062_v2 = vcombine.low %v114_v52, %v118_v54  ;;  %v2428_v42 = vld [vmem:[%s3060_s2 + $0x38] sm:$0xff]  ;;  %vm1375_vm0 = vcmp.lt.s32.totalorder %v2409_v37, 97 }
  0x68   :  { %v2423_v41 = vld [vmem:[%s3060_s2 + $0x30] sm:$0xff]  ;;  %vm1451_vm1 = vcmp.lt.s32.totalorder %v2409_v37, 96  ;;  %vm1527_vm2 = vcmp.lt.s32.totalorder %v2409_v37, 95  ;;  %vm1299_vm3 = vcmp.lt.s32.totalorder %v2409_v37, 127  ;;  %vm1223_vm4 = vcmp.lt.s32.totalorder %v2409_v37, 1 }
  0x69   :  { %vm1147_vm5 = vcmp.lt.s32.totalorder %v2409_v37, 31  ;;  %vm1071_vm7 = vcmp.lt.s32.totalorder %v2409_v37, 32  ;;  %vm996_vm8 = vcmp.lt.s32.totalorder %v2409_v37, 33 }
  0x6a   :  { %909 = vmatpush1.bf16.msra.mxu0 %v1996_v63  ;;  %950 = vmatpush1.bf16.msra.mxu1 %v1998_v1  ;;  %v110_v63 = vld [vmem:[#allocation2 + $0x238] sm:$0xff]  ;;  %v2053_v1 = vcombine.high %v105_v59, %v109_v60 }
  0x6b   :  { %910 = vmatprep.subr.bf16.mxu0 %v1989_v0  ;;  %951 = vmatprep.subr.bf16.mxu1 %v1991_v4  ;;  %v2060_v0 = vcombine.low %v113_v49, %v117_v50  ;;  %v2055_v3 = vcombine.high %v106_v62, %v110_v63  ;;  %v2052_v4 = vcombine.low %v105_v59, %v109_v60  ;;  %v2465_v60 = vsub.s32 0, %v2411_v38 }
  0x6c   :  { %v2054_v5 = vcombine.low %v106_v62, %v110_v63  ;;  %v2475_v63 = vld [vmem:[%s3060_s2 + $0x40] sm:$0xff] }
  0x6e   :  { %911 = vmatpush1.bf16.msra.mxu0 %v1988_v7  ;;  %952 = vmatpush1.bf16.msra.mxu1 %v1990_v9 }
  0x6f   :  { %912 = vmatprep.subr.bf16.mxu0 %v2109_v8  ;;  %953 = vmatprep.subr.bf16.mxu1 %v2111_v13 }
  0x72   :  { %913 = vmatpush2.bf16.msra.mxu0 %v2108_v16  ;;  %954 = vmatpush2.bf16.msra.mxu1 %v2110_v18 }
  0x73   :  { %914 = vmatprep.subr.bf16.mxu0 %v2101_v17  ;;  %955 = vmatprep.subr.bf16.mxu1 %v2103_v21 }
  0x76   :  { %915 = vmatpush2.bf16.msra.mxu0 %v2100_v23  ;;  %956 = vmatpush2.bf16.msra.mxu1 %v2102_v25 }
  0x77   :  { %916 = vmatprep.subr.bf16.mxu0 %v2093_v24  ;;  %957 = vmatprep.subr.bf16.mxu1 %v2095_v28 }
  0x7a   :  { %917 = vmatpush2.bf16.msra.mxu0 %v2092_v31  ;;  %958 = vmatpush2.bf16.msra.mxu1 %v2094_v33 }
  0x7b   :  { %918 = vmatprep.subr.bf16.mxu0 %v2085_v32  ;;  %959 = vmatprep.subr.bf16.mxu1 %v2087_v36 }
  0x7e   :  { %919 = vmatpush2.bf16.msra.mxu0 %v2084_v39  ;;  %960 = vmatpush2.bf16.msra.mxu1 %v2086_v57 }
  0x7f   :  { %920 = vmatprep.subr.bf16.mxu0 %v2077_v40  ;;  %961 = vmatprep.subr.bf16.mxu1 %v2079_v43  ;;  %v2416_v40 = vsub.s32 2, %v2411_v38 }
  0x81   :  { %v1398_v43 = vrot.slane %v2423_v41, %v2416_v40  ;;  %v1474_v44 = vrot.slane %v2428_v42, %v2416_v40 }
  0x82   :  { %921 = vmatpush2.bf16.msra.mxu0 %v2076_v46  ;;  %962 = vmatpush2.bf16.msra.mxu1 %v2078_v48 }
  0x83   :  { %922 = vmatprep.subr.bf16.mxu0 %v2069_v47  ;;  %963 = vmatprep.subr.bf16.mxu1 %v2071_v51 }
  0x86   :  { %923 = vmatpush2.bf16.msra.mxu0 %v2068_v55  ;;  %964 = vmatpush2.bf16.msra.mxu1 %v2070_v58 }
  0x87   :  { %924 = vmatprep.subr.bf16.mxu0 %v2061_v56  ;;  %965 = vmatprep.subr.bf16.mxu1 %v2063_v61  ;;  %v2468_v61 = vsub.s32 1, %v2411_v38 }
  0x8a   :  { %925 = vmatpush2.bf16.msra.mxu0 %v2060_v0  ;;  %966 = vmatpush2.bf16.msra.mxu1 %v2062_v2  ;;  %v2484_v2 = vld [vmem:[%s3060_s2 + $0x28] sm:$0xff] }
  0x8b   :  { %926 = vmatprep.subr.bf16.mxu0 %v2053_v1  ;;  %967 = vmatprep.subr.bf16.mxu1 %v2055_v3  ;;  %v1470_v1 = vrot.slane %v2428_v42, %v2468_v61  ;;  %v1542_v3 = vrot.slane %v2475_v63, %v2465_v60 }
  0x8e   :  { %927 = vmatpush2.bf16.msra.mxu0 %v2052_v4  ;;  %968 = vmatpush2.bf16.msra.mxu1 %v2054_v5  ;;  %v1546_v4 = vrot.slane %v2475_v63, %v2468_v61  ;;  %v1390_v5 = vrot.slane %v2423_v41, %v2465_v60 }
  0x91   :  { %929 = vmatmul.mubr.bf16.vlgmr.msra.gmra.mxu0 %v2231_v12  ;;  %970 = vmatmul.mubr.bf16.vlgmr.msra.gmra.mxu1 %v2231_v12 }
  0x92   :  { %1695 = vmatprep.mubr.bf16.mxu0 %v3065_v22  ;;  %1738 = vmatprep.mubr.bf16.mxu1 %v3065_v22  ;;  %v1314_v22 = vrot.slane %v2484_v2, %v2465_v60 }
 0x111   :  { %v2239_v6 = vpop.f32.mrf.mxu0  ;;  %v2241_v7 = vpop.f32.mrf.mxu1 }
 0x112   :  { %1511 = vrot.lane.b32.xlu0 %v2239_v6, %s2171_s0  ;;  %1515 = vrot.lane.b32.xlu1 %v2241_v7, %s2171_s0 }
 0x113   :  { %v2247_v8 = vpop.f32.mrf.mxu0  ;;  %v2249_v9 = vpop.f32.mrf.mxu1 }
 0x115   :  { %v852_v10 = vpop.f32.mrf.mxu0  ;;  %v893_v11 = vpop.f32.mrf.mxu1 }
 0x116   :  { %1363 = vrot.lane.b32.xlu0 %v2241_v7, %s2172_s29  ;;  %1359 = vrot.lane.b32.xlu1 %v2239_v6, %s2172_s29  ;;  %v1394_v11 = vrot.slane %v2423_v41, %v2468_v61 }
 0x117   :  { %v853_v12 = vpop.f32.mrf.mxu0  ;;  %v894_v13 = vpop.f32.mrf.mxu1 }
 0x118   :  { %v1466_v12 = vrot.slane %v2428_v42, %v2465_v60 }
 0x11a   :  { %1439 = vrot.lane.b32.xlu0 %v2241_v7, %s2173_s30  ;;  %1283 = vrot.lane.b32.xlu1 %v2239_v6, %s2174_s7 }
 0x11e   :  { %1435 = vrot.lane.b32.xlu0 %v2239_v6, %s2173_s30  ;;  %1361 = vrot.lane.b32.xlu1 %v2247_v8, %s2172_s29 }
 0x122   :  { %1287 = vrot.lane.b32.xlu0 %v2241_v7, %s2174_s7  ;;  %1437 = vrot.lane.b32.xlu1 %v2247_v8, %s2173_s30 }
 0x126   :  { %1131 = vrot.lane.b32.xlu0 %v2239_v6, %s2175_s8  ;;  %1517 = vrot.lane.b32.xlu1 %v2249_v9, %s2171_s0 }
 0x12a   :  { %1207 = vrot.lane.b32.xlu0 %v2239_v6, %s2176_s9  ;;  %1285 = vrot.lane.b32.xlu1 %v2247_v8, %s2174_s7 }
 0x12e   :  { %978 = vrot.lane.b32.xlu0 %v2239_v6, %s2177_s10  ;;  %1365 = vrot.lane.b32.xlu1 %v2249_v9, %s2172_s29 }
 0x132   :  { %1055 = vrot.lane.b32.xlu0 %v2239_v6, %s2170_s25  ;;  %1441 = vrot.lane.b32.xlu1 %v2249_v9, %s2173_s30 }
 0x136   :  { %1135 = vrot.lane.b32.xlu0 %v2241_v7, %s2175_s8  ;;  %1133 = vrot.lane.b32.xlu1 %v2247_v8, %s2175_s8 }
 0x13a   :  { %1211 = vrot.lane.b32.xlu0 %v2241_v7, %s2176_s9  ;;  %1209 = vrot.lane.b32.xlu1 %v2247_v8, %s2176_s9 }
 0x13e   :  { %982 = vrot.lane.b32.xlu0 %v2241_v7, %s2177_s10  ;;  %980 = vrot.lane.b32.xlu1 %v2247_v8, %s2177_s10 }
 0x142   :  { %1059 = vrot.lane.b32.xlu0 %v2241_v7, %s2170_s25  ;;  %1057 = vrot.lane.b32.xlu1 %v2247_v8, %s2170_s25 }
 0x146   :  { %1513 = vrot.lane.b32.xlu0 %v2247_v8, %s2171_s0  ;;  %1137 = vrot.lane.b32.xlu1 %v2249_v9, %s2175_s8 }
 0x14a   :  { %1289 = vrot.lane.b32.xlu0 %v2249_v9, %s2174_s7  ;;  %1213 = vrot.lane.b32.xlu1 %v2249_v9, %s2176_s9 }
 0x14e   :  { %984 = vrot.lane.b32.xlu1 %v2249_v9, %s2177_s10 }
 0x151   :  { %v2309_v14 = vpop.f32.mrf.mxu0  ;;  %v2313_v15 = vpop.f32.mrf.mxu1 }
 0x152   :  { %1519 = vrot.lane.b32.xlu0 %v2309_v14, %s2171_s0  ;;  %3068 = vst [vmem:[#allocation5_spill] sm:$0xff] %v2313_v15  ;;  %1061 = vrot.lane.b32.xlu1 %v2249_v9, %s2170_s25 }
 0x153   :  { %v2317_v16 = vpop.f32.mrf.mxu0  ;;  %v2319_v17 = vpop.f32.mrf.mxu1 }
 0x155   :  { %v934_v18 = vpop.f32.mrf.mxu0  ;;  %v975_v19 = vpop.f32.mrf.mxu1 }
 0x156   :  { %1367 = vrot.lane.b32.xlu0 %v2309_v14, %s2172_s29  ;;  %1291 = vrot.lane.b32.xlu1 %v2309_v14, %s2174_s7  ;;  %v1318_v19 = vrot.slane %v2484_v2, %v2468_v61 }
 0x157   :  { %v935_v20 = vpop.f32.mrf.mxu0  ;;  %v976_v21 = vpop.f32.mrf.mxu1 }
 0x15a   :  { %1443 = vrot.lane.b32.xlu0 %v2309_v14, %s2173_s30  ;;  %1523 = vrot.lane.b32.xlu1 %v2313_v15, %s2171_s0 }
 0x15e   :  { %1295 = vrot.lane.b32.xlu0 %v2313_v15, %s2174_s7  ;;  %1371 = vrot.lane.b32.xlu1 %v2313_v15, %s2172_s29 }
 0x162   :  { %986 = vrot.lane.b32.xlu0 %v2309_v14, %s2177_s10  ;;  %1447 = vrot.lane.b32.xlu1 %v2313_v15, %s2173_s30 }
 0x166   :  { %1063 = vrot.lane.b32.xlu0 %v2309_v14, %s2170_s25  ;;  %1139 = vrot.lane.b32.xlu1 %v2309_v14, %s2175_s8 }
 0x16a   :  { %1145 = vrot.lane.b32.xlu0 %v2319_v17, %s2175_s8  ;;  %1215 = vrot.lane.b32.xlu1 %v2309_v14, %s2176_s9 }
 0x16e   :  { %992 = vrot.lane.b32.xlu0 %v2319_v17, %s2177_s10  ;;  %1221 = vrot.lane.b32.xlu1 %v2319_v17, %s2176_s9 }
 0x172   :  { %1521 = vrot.lane.b32.xlu0 %v2317_v16, %s2171_s0  ;;  %1069 = vrot.lane.b32.xlu1 %v2319_v17, %s2170_s25 }
 0x176   :  { %1369 = vrot.lane.b32.xlu0 %v2317_v16, %s2172_s29  ;;  %1293 = vrot.lane.b32.xlu1 %v2317_v16, %s2174_s7 }
 0x17a   :  { %1445 = vrot.lane.b32.xlu0 %v2317_v16, %s2173_s30  ;;  %1373 = vrot.lane.b32.xlu1 %v2319_v17, %s2172_s29 }
 0x17e   :  { %1525 = vrot.lane.b32.xlu0 %v2319_v17, %s2171_s0  ;;  %1219 = vrot.lane.b32.xlu1 %v2313_v15, %s2176_s9 }
 0x182   :  { %1449 = vrot.lane.b32.xlu0 %v2319_v17, %s2173_s30  ;;  %1297 = vrot.lane.b32.xlu1 %v2319_v17, %s2174_s7 }
 0x184   :  { %v2373_v53 = vpop.permute.xlu0 %1511  ;;  %v2375_v23 = vpop.permute.xlu1 %1515 }
 0x186   :  { %1141 = vrot.lane.b32.xlu0 %v2317_v16, %s2175_s8  ;;  %988 = vrot.lane.b32.xlu1 %v2317_v16, %s2177_s10 }
 0x188   :  { %v1364_v24 = vpop.permute.xlu0 %1363  ;;  %v2381_v25 = vpop.permute.xlu1 %1359 }
 0x18a   :  { %1217 = vrot.lane.b32.xlu0 %v2317_v16, %s2176_s9  ;;  %1065 = vrot.lane.b32.xlu1 %v2317_v16, %s2170_s25 }
 0x18c   :  { %v1440_v26 = vpop.permute.xlu0 %1439  ;;  %v2387_v27 = vpop.permute.xlu1 %1283 }
 0x18e   :  { %1143 = vrot.lane.b32.xlu0 %v2313_v15, %s2175_s8  ;;  %1067 = vrot.lane.b32.xlu1 %v2313_v15, %s2170_s25 }
 0x190   :  { %v2393_v28 = vpop.permute.xlu0 %1435  ;;  %v2395_v29 = vpop.permute.xlu1 %1361 }
 0x191   :  { %v1381_v18 = vsel %vm1375_vm0, %v2395_v29, %v1364_v24 }
 0x192   :  { %990 = vrot.lane.b32.xlu0 %v2313_v15, %s2177_s10 }
 0x194   :  { %v2399_v30 = vpop.permute.xlu0 %1287  ;;  %v1438_v31 = vpop.permute.xlu1 %1437 }
 0x195   :  { %v1457_v10 = vsel %vm1451_vm1, %v1438_v31, %v1440_v26  ;;  %v1458_v34 = vsel %vm1451_vm1, %v2393_v28, %v1438_v31  ;;  %v1382_v31 = vsel %vm1375_vm0, %v2381_v25, %v2395_v29 }
 0x198   :  { %v2401_v32 = vpop.permute.xlu0 %1131  ;;  %v2403_v33 = vpop.permute.xlu1 %1517 }
 0x19c   :  { %v2405_v35 = vpop.permute.xlu0 %1207  ;;  %v2407_v36 = vpop.permute.xlu1 %1285 }
 0x19d   :  { %v1306_v29 = vsel %vm1299_vm3, %v2387_v27, %v2407_v36 }
 0x1a0   :  { %v2413_v39 = vpop.permute.xlu0 %978  ;;  %v2418_v57 = vpop.permute.xlu1 %1365 }
 0x1a1   :  { %v1380_v45 = vsel %vm1375_vm0, %v1364_v24, %v2418_v57  ;;  %v2519_v24 = vld [vmem:[%s3060_s2 + $0x18] sm:$0xff] }
 0x1a2   :  { %v2446_v49 = vmul.f32 %v1398_v43, %v1380_v45  ;;  %v1504_v43 = vmul.f32 %v1470_v1, %v1457_v10  ;;  %v1428_v1 = vmul.f32 %v1394_v11, %v1381_v18  ;;  %v1503_v10 = vmul.f32 %v1466_v12, %v1458_v34 }
 0x1a3   :  { %v1427_v34 = vmul.f32 %v1390_v5, %v1382_v31 }
 0x1a4   :  { %v2438_v46 = vpop.permute.xlu0 %1055  ;;  %v2441_v47 = vpop.permute.xlu1 %1441  ;;  %v1612_v18 = vpack.c.bf16 %v1504_v43, %v1428_v1  ;;  %v1351_v43 = vmul.f32 %v1314_v22, %v1306_v29 }
 0x1a5   :  { %v1456_v48 = vsel %vm1451_vm1, %v1440_v26, %v2441_v47  ;;  %v1611_v5 = vpack.c.bf16 %v1503_v10, %v1427_v34 }
 0x1a6   :  { %v2448_v50 = vmul.f32 %v1474_v44, %v1456_v48  ;;  %v1550_v48 = vrot.slane %v2475_v63, %v2416_v40  ;;  %v1603_v22 = vpack.c.bf16 %v1351_v43, %v2239_v6 }
 0x1a8   :  { %v2450_v51 = vpop.permute.xlu0 %1135  ;;  %v2454_v54 = vpop.permute.xlu1 %1133 }
 0x1ac   :  { %v2456_v55 = vpop.permute.xlu0 %1211  ;;  %v2458_v56 = vpop.permute.xlu1 %1209 }
 0x1b0   :  { %v2460_v58 = vpop.permute.xlu0 %982  ;;  %v2462_v59 = vpop.permute.xlu1 %980 }
 0x1b4   :  { %v2470_v62 = vpop.permute.xlu0 %1059  ;;  %v2477_v0 = vpop.permute.xlu1 %1057 }
 0x1b8   :  { %v1514_v13 = vpop.permute.xlu0 %1513  ;;  %v2505_v20 = vpop.permute.xlu1 %1137 }
 0x1b9   :  { %v1533_v21 = vsel %vm1527_vm2, %v1514_v13, %v2375_v23  ;;  %v1534_v26 = vsel %vm1527_vm2, %v2373_v53, %v1514_v13  ;;  %v1305_v13 = vsel %vm1299_vm3, %v2407_v36, %v2399_v30 }
 0x1ba   :  { %v1579_v44 = vmul.f32 %v1542_v3, %v1534_v26  ;;  %v1580_v45 = vmul.f32 %v1546_v4, %v1533_v21  ;;  %v2538_v21 = vld [vmem:[%s3060_s2 + $0x10] sm:$0xff]  ;;  %v1242_v26 = vrot.slane %v2519_v24, %v2468_v61  ;;  %v1352_v11 = vmul.f32 %v1318_v19, %v1305_v13 }
 0x1bb   :  { %v1166_v36 = vrot.slane %v2538_v21, %v2468_v61  ;;  %v2561_v19 = vsub.s32 3, %v2411_v38 }
 0x1bc   :  { %v1619_v3 = vpack.c.bf16 %v1579_v44, %v1579_v44  ;;  %v1620_v4 = vpack.c.bf16 %v1580_v45, %v1580_v45  ;;  %v2542_v52 = vpop.permute.xlu1 %1213  ;;  %v1532_v44 = vsel %vm1527_vm2, %v2375_v23, %v2403_v33  ;;  %v1230_v45 = vsel %vm1223_vm4, %v2405_v35, %v2458_v56  ;;  %v1290_v13 = vpop.permute.xlu0 %1289 }
 0x1bd   :  { %v1154_v23 = vsel %vm1147_vm5, %v2401_v32, %v2454_v54  ;;  %v1581_v1 = vmul.f32 %v1550_v48, %v1532_v44  ;;  %v1326_v6 = vrot.slane %v2484_v2, %v2561_v19 }
 0x1be   :  { %2120 = vmatprep.subr.msk.bf16.mxu0 %vm1638_vm6, %v1620_v4  ;;  %v1640_v12 = vsel %vm1638_vm6, %v1619_v3, 0  ;;  %v1276_v3 = vmul.f32 %v1242_v26, %v1230_v45  ;;  %v1604_v4 = vpack.c.bf16 %v1352_v11, %v2247_v8  ;;  %v1200_v15 = vmul.f32 %v1166_v36, %v1154_v23 }
 0x1bf   :  { %1670 = vmatpush1.bf16.msra.mxu0 %v1640_v12  ;;  %v1554_v12 = vrot.slane %v2475_v63, %v2561_v19  ;;  %v1621_v26 = vpack.c.bf16 %v1581_v1, %v1581_v1  ;;  %v1402_v45 = vrot.slane %v2423_v41, %v2561_v19  ;;  %v1250_v23 = vrot.slane %v2519_v24, %v2561_v19 }
 0x1c0   :  { %1671 = vmatprep.subr.bf16.mxu0 %v1612_v18  ;;  %v2567_v31 = vpop.permute.xlu1 %984  ;;  %v1596_v8 = vpack.c.bf16 %v1276_v3, %v1200_v15  ;;  %v1478_v15 = vrot.slane %v2428_v42, %v2561_v19  ;;  %v1322_v1 = vrot.slane %v2484_v2, %v2416_v40 }
 0x1c3   :  { %1672 = vmatpush1.bf16.msra.mxu0 %v1611_v5 }
 0x1c4   :  { %1673 = vmatprep.subr.bf16.mxu0 %v1604_v4  ;;  %v2572_v18 = vpop.permute.xlu0 %1519  ;;  %v2575_v10 = vpop.permute.xlu1 %1061 }
 0x1c5   :  { %v1531_v48 = vsel %vm1527_vm2, %v2403_v33, %v2572_v18  ;;  %v1646_v33 = vsel %vm1638_vm6, %v1621_v26, 0  ;;  %v1228_v26 = vsel %vm1223_vm4, %v2456_v55, %v2542_v52 }
 0x1c6   :  { %v1582_v29 = vmul.f32 %v1554_v12, %v1531_v48 }
 0x1c7   :  { %1674 = vmatpush1.bf16.msra.mxu0 %v1603_v22 }
 0x1c8   :  { %v1622_v11 = vpack.c.bf16 %v1582_v29, %v1582_v29  ;;  %1675 = vmatprep.subr.bf16.mxu0 %v1596_v8  ;;  %v2581_v34 = vpop.permute.xlu0 %1367  ;;  %v2583_v44 = vpop.permute.xlu1 %1291  ;;  %v1174_v29 = vrot.slane %v2538_v21, %v2561_v19 }
 0x1c9   :  { %v1303_v36 = vsel %vm1299_vm3, %v1290_v13, %v2583_v44  ;;  %v1379_v5 = vsel %vm1375_vm0, %v2418_v57, %v2581_v34  ;;  %v1304_v57 = vsel %vm1299_vm3, %v2399_v30, %v1290_v13  ;;  %v2629_v30 = vld [vmem:[%s3060_s2 + $0x8] sm:$0xff]  ;;  %v1152_v13 = vsel %vm1147_vm5, %v2450_v51, %v2505_v20 }
 0x1ca   :  { %2122 = vmatprep.subr.msk.bf16.mxu1 %vm1638_vm6, %v1622_v11  ;;  %v1354_v12 = vmul.f32 %v1326_v6, %v1303_v36  ;;  %v1430_v22 = vmul.f32 %v1402_v45, %v1379_v5  ;;  %v1353_v6 = vmul.f32 %v1322_v1, %v1304_v57  ;;  %v1098_v36 = vrot.slane %v2629_v30, %v2561_v19  ;;  %v2649_v1 = vld [vmem:[%s3060_s2] sm:$0xff] }
 0x1cb   :  { %1713 = vmatpush1.bf16.msra.mxu1 %v1646_v33  ;;  %v1229_v33 = vsel %vm1223_vm4, %v2458_v56, %v2456_v55  ;;  %v1076_v55 = vsel %vm1071_vm7, %v2470_v62, %v2575_v10  ;;  %v3069_v56 = vpack.c.bf16 %v2448_v50, %v2446_v49  ;;  %v1022_v57 = vrot.slane %v2649_v1, %v2561_v19 }
 0x1cc   :  { %v2600_v43 = vpop.permute.xlu0 %1443  ;;  %v2606_v3 = vpop.permute.xlu1 %1523  ;;  %v1606_v5 = vpack.c.bf16 %v1354_v12, %v2249_v9  ;;  %v1153_v9 = vsel %vm1147_vm5, %v2454_v54, %v2450_v51  ;;  %v1605_v49 = vpack.c.bf16 %v1353_v6, %v2241_v7  ;;  %v1001_v50 = vsel %vm996_vm8, %v2460_v58, %v2567_v31 }
 0x1cd   :  { %v1455_v4 = vsel %vm1451_vm1, %v2441_v47, %v2600_v43  ;;  %v1246_v47 = vrot.slane %v2519_v24, %v2416_v40  ;;  %v1077_v54 = vsel %vm1071_vm7, %v2477_v0, %v2470_v62  ;;  %v1126_v19 = vmul.f32 %v1098_v36, %v1076_v55 }
 0x1ce   :  { %v1506_v48 = vmul.f32 %v1478_v15, %v1455_v4  ;;  %v1278_v15 = vmul.f32 %v1250_v23, %v1228_v26  ;;  %v1170_v4 = vrot.slane %v2538_v21, %v2416_v40  ;;  %v1202_v23 = vmul.f32 %v1174_v29, %v1152_v13 }
 0x1cf   :  { %v1002_v7 = vsel %vm996_vm8, %v2462_v59, %v2460_v58  ;;  %v2689_v62 = vsub.s32 4, %v2411_v38 }
 0x1d0   :  { %v2621_v8 = vpop.permute.xlu0 %1295  ;;  %v1614_v11 = vpack.c.bf16 %v1506_v48, %v1430_v22  ;;  %v2635_v45 = vpop.permute.xlu1 %1371  ;;  %v1277_v22 = vmul.f32 %v1246_v47, %v1229_v33  ;;  %v1094_v48 = vrot.slane %v2629_v30, %v2416_v40  ;;  %v1598_v26 = vpack.c.bf16 %v1278_v15, %v1202_v23 }
 0x1d1   :  { %v1201_v29 = vmul.f32 %v1170_v4, %v1153_v9  ;;  %v1050_v47 = vmul.f32 %v1022_v57, %v1001_v50  ;;  %v1254_v58 = vrot.slane %v2519_v24, %v2689_v62  ;;  %v1090_v23 = vrot.slane %v2629_v30, %v2468_v61 }
 0x1d2   :  { %1714 = vmatprep.subr.bf16.mxu1 %v1614_v11  ;;  %v1018_v11 = vrot.slane %v2649_v1, %v2416_v40  ;;  %v1125_v33 = vmul.f32 %v1094_v48, %v1077_v54  ;;  %v1178_v40 = vrot.slane %v2538_v21, %v2689_v62  ;;  %v2714_v48 = vsub.s32 5, %v2411_v38 }
 0x1d3   :  { %1715 = vmatpush1.bf16.msra.mxu1 %v3069_v56  ;;  %v1597_v6 = vpack.c.bf16 %v1277_v22, %v1201_v29  ;;  %v1590_v36 = vpack.c.bf16 %v1126_v19, %v1050_v47  ;;  %v1162_v22 = vrot.slane %v2538_v21, %v2465_v60  ;;  %v1238_v54 = vrot.slane %v2519_v24, %v2465_v60 }
 0x1d4   :  { %1716 = vmatprep.subr.bf16.mxu1 %v1606_v5  ;;  %v2665_v12 = vpop.permute.xlu0 %986  ;;  %v2674_v51 = vpop.permute.xlu1 %1447  ;;  %v1049_v5 = vmul.f32 %v1018_v11, %v1002_v7  ;;  %v1003_v29 = vsel %vm996_vm8, %v2413_v39, %v2462_v59  ;;  %v1558_v47 = vrot.slane %v2475_v63, %v2689_v62 }
 0x1d6   :  { %v1589_v56 = vpack.c.bf16 %v1125_v33, %v1049_v5  ;;  %v1086_v5 = vrot.slane %v2629_v30, %v2465_v60 }
 0x1d7   :  { %1717 = vmatpush1.bf16.msra.mxu1 %v1605_v49 }
 0x1d8   :  { %1718 = vmatprep.subr.bf16.mxu1 %v1598_v26  ;;  %v2686_v13 = vpop.permute.xlu0 %1063  ;;  %v2691_v15 = vpop.permute.xlu1 %1139 }
 0x1d9   :  { %v1151_v4 = vsel %vm1147_vm5, %v2505_v20, %v2691_v15  ;;  %v1078_v20 = vsel %vm1071_vm7, %v2438_v46, %v2477_v0  ;;  %v2737_v0 = vld [vmem:[%s3061_s3] sm:$0xff]  }
 0x1da   :  { %v2720_v49 = vmul.f32 %v1178_v40, %v1151_v4  ;;  %v1124_v7 = vmul.f32 %v1090_v23, %v1078_v20  ;;  %v3070_v40 = vmov 0  }
 0x1db   :  { %1719 = vmatpush1.bf16.msra.mxu1 %v1597_v6  ;;  %v1562_v6 = vrot.slane %v2475_v63, %v2714_v48 }
 0x1dc   :  { %1720 = vmatprep.subr.bf16.mxu1 %v1590_v36  ;;  %v2701_v55 = vpop.permute.xlu0 %1145  ;;  %v2703_v9 = vpop.permute.xlu1 %1215  ;;  %v1010_v36 = vrot.slane %v2649_v1, %v2465_v60 }
 0x1dd   :  { %v1227_v57 = vsel %vm1223_vm4, %v2542_v52, %v2703_v9  ;;  %v1014_v52 = vrot.slane %v2649_v1, %v2468_v61  ;;  %v1155_v19 = vsel %vm1147_vm5, %v2701_v55, %v2401_v32 }
 0x1de   :  { %v2722_v50 = vmul.f32 %v1254_v58, %v1227_v57  ;;  %v1199_v59 = vmul.f32 %v1162_v22, %v1155_v19 }
 0x1df   :  { %1721 = vmatpush1.bf16.msra.mxu1 %v1589_v56 }
 0x1e0   :  { %v2732_v26 = vpop.permute.xlu0 %992  ;;  %v1599_v61 = vpack.c.bf16 %v2722_v50, %v2720_v49  ;;  %v2745_v11 = vpop.permute.xlu1 %1221 }
 0x1e1   :  { %v1231_v32 = vsel %vm1223_vm4, %v2745_v11, %v2405_v35  ;;  %v1048_v35 = vmul.f32 %v1014_v52, %v1003_v29  ;;  %v1004_v58 = vsel %vm996_vm8, %v2732_v26, %v2413_v39 }
 0x1e2   :  { %2123 = vmatmul.mubr.msk.bf16.vlgmr.msra.gmra.mxu1 %vm1634_vm9, %v2737_v0  ;;  %v1275_v33 = vmul.f32 %v1238_v54, %v1231_v32  ;;  %v1047_v52 = vmul.f32 %v1010_v36, %v1004_v58  ;;  %v1334_v32 = vrot.slane %v2484_v2, %v2714_v48  ;;  %v1486_v58 = vrot.slane %v2428_v42, %v2714_v48 }
 0x1e3   :  { %1824 = vmatprep.mubr.bf16.mxu1 %v3070_v40  ;;  %v1588_v39 = vpack.c.bf16 %v1124_v7, %v1048_v35  ;;  %v2788_v7 = vsub.s32 7, %v2411_v38 }
 0x1e4   :  { %v1522_v4 = vpop.permute.xlu0 %1521  ;;  %v1595_v56 = vpack.c.bf16 %v1275_v33, %v1199_v59  ;;  %v2766_v23 = vpop.permute.xlu1 %1069  ;;  %v1406_v59 = vrot.slane %v2423_v41, %v2689_v62 }
 0x1e5   :  { %v1529_v57 = vsel %vm1527_vm2, %v1522_v4, %v2606_v3  ;;  %v1530_v60 = vsel %vm1527_vm2, %v2572_v18, %v1522_v4  ;;  %v1079_v22 = vsel %vm1071_vm7, %v2766_v23, %v2438_v46  ;;  %v1410_v18 = vrot.slane %v2423_v41, %v2714_v48 }
 0x1e6   :  { %v1583_v20 = vmul.f32 %v1558_v47, %v1530_v60  ;;  %v1584_v54 = vmul.f32 %v1562_v6, %v1529_v57  ;;  %v1123_v19 = vmul.f32 %v1086_v5, %v1079_v22  ;;  %1676 = vmatpush1.bf16.msra.mxu0 %v1595_v56  ;;  %v2785_v47 = vsub.s32 6, %v2411_v38 }
 0x1e7   :  { %1677 = vmatprep.subr.bf16.mxu0 %v1588_v39  ;;  %v1482_v6 = vrot.slane %v2428_v42, %v2689_v62  ;;  %v1330_v56 = vrot.slane %v2484_v2, %v2689_v62  ;;  %v1570_v22 = vrot.slane %v2475_v63, %v2788_v7 }
 0x1e8   :  { %v1624_v29 = vpack.c.bf16 %v1584_v54, %v1584_v54  ;;  %v1370_v33 = vpop.permute.xlu0 %1369  ;;  %v1587_v4 = vpack.c.bf16 %v1123_v19, %v1047_v52  ;;  %v1294_v46 = vpop.permute.xlu1 %1293  ;;  %v1623_v36 = vpack.c.bf16 %v1583_v20, %v1583_v20 }
 0x1e9   :  { %v1377_v5 = vsel %vm1375_vm0, %v1370_v33, %v2635_v45  ;;  %v1378_v35 = vsel %vm1375_vm0, %v2581_v34, %v1370_v33  ;;  %v1301_v38 = vsel %vm1299_vm3, %v1294_v46, %v2621_v8  ;;  %v1302_v57 = vsel %vm1299_vm3, %v2583_v44, %v1294_v46 }
 0x1ea   :  { %1678 = vmatpush1.bf16.msra.mxu0 %v1587_v4  ;;  %v1566_v34 = vrot.slane %v2475_v63, %v2785_v47  ;;  %v1431_v20 = vmul.f32 %v1406_v59, %v1378_v35  ;;  %v1432_v54 = vmul.f32 %v1410_v18, %v1377_v5  ;;  %v1356_v19 = vmul.f32 %v1334_v32, %v1301_v38 }
 0x1eb   :  { %2124 = vmatprep.subr.msk.bf16.mxu0 %vm1638_vm6, %v1624_v29  ;;  %v1652_v4 = vsel %vm1638_vm6, %v1623_v36, 0  ;;  %v1414_v63 = vrot.slane %v2423_v41, %v2785_v47  ;;  %v1418_v59 = vrot.slane %v2423_v41, %v2788_v7  ;;  %v1490_v32 = vrot.slane %v2428_v42, %v2785_v47 }
 0x1ec   :  { %v1446_v60 = vpop.permute.xlu0 %1445  ;;  %v1374_v39 = vpop.permute.xlu1 %1373  ;;  %v1494_v41 = vrot.slane %v2428_v42, %v2788_v7  ;;  %v1338_v42 = vrot.slane %v2484_v2, %v2785_v47 }
 0x1ed   :  { %v1453_v52 = vsel %vm1451_vm1, %v1446_v60, %v2674_v51  ;;  %v1454_v44 = vsel %vm1451_vm1, %v2600_v43, %v1446_v60  ;;  %2121 = vmatmul.mubr.msk.bf16.vlgmr.msra.gmra.mxu0 %vm1634_vm9, %v2737_v0  ;;  %v1376_v35 = vsel %vm1375_vm0, %v2635_v45, %v1374_v39 }
 0x1ee   :  { %v1507_v29 = vmul.f32 %v1482_v6, %v1454_v44  ;;  %v1508_v33 = vmul.f32 %v1486_v58, %v1453_v52  ;;  %1756 = vmatpush1.bf16.msra.mxu0 %v1652_v4  ;;  %1781 = vmatprep.mubr.bf16.mxu0 %v3070_v40  ;;  %v1355_v6 = vmul.f32 %v1330_v56, %v1302_v57 }
 0x1ef   :  { %v1608_v56 = vpack.c.bf16 %v1356_v19, %v2317_v16 }
 0x1f0   :  { %v1615_v18 = vpack.c.bf16 %v1507_v29, %v1431_v20  ;;  %v1526_v46 = vpop.permute.xlu0 %1525  ;;  %v1616_v43 = vpack.c.bf16 %v1508_v33, %v1432_v54  ;;  %v2829_v5 = vpop.permute.xlu1 %1219  ;;  %v1026_v33 = vrot.slane %v2649_v1, %v2689_v62 }
 0x1f1   :  { %v1528_v36 = vsel %vm1527_vm2, %v2606_v3, %v1526_v46  ;;  %v1535_v40 = vsel %vm1527_vm2, %v1526_v46, %v2373_v53  ;;  %v1383_v3 = vsel %vm1375_vm0, %v1374_v39, %v2381_v25  ;;  %v1342_v53 = vrot.slane %v2484_v2, %v2788_v7 }
 0x1f2   :  { %v1585_v58 = vmul.f32 %v1566_v34, %v1528_v36  ;;  %v1586_v38 = vmul.f32 %v1570_v22, %v1535_v40  ;;  %1757 = vmatprep.subr.bf16.mxu0 %v1616_v43  ;;  %v1607_v34 = vpack.c.bf16 %v1355_v6, %v2309_v14  ;;  %v1433_v22 = vmul.f32 %v1414_v63, %v1376_v35 }
 0x1f3   :  { %1758 = vmatpush1.bf16.msra.mxu0 %v1615_v18  ;;  %v1434_v54 = vmul.f32 %v1418_v59, %v1383_v3  ;;  %v1266_v63 = vrot.slane %v2519_v24, %v2788_v7  ;;  %v1258_v18 = vrot.slane %v2519_v24, %v2714_v48  ;;  %v1030_v46 = vrot.slane %v2649_v1, %v2714_v48 }
 0x1f4   :  { %v1625_v57 = vpack.c.bf16 %v1585_v58, %v1585_v58  ;;  %v1626_v60 = vpack.c.bf16 %v1586_v38, %v1586_v38  ;;  %1759 = vmatprep.subr.bf16.mxu0 %v1608_v56  ;;  %v1450_v45 = vpop.permute.xlu0 %1449  ;;  %v1298_v20 = vpop.permute.xlu1 %1297  ;;  %v1262_v6 = vrot.slane %v2519_v24, %v2785_v47  ;;  %v1110_v40 = vrot.slane %v2629_v30, %v2785_v47  ;;  %v3071_v58 = vld [vmem:[#allocation5_spill] sm:$0xff] }
 0x1f5   :  { %v1452_v16 = vsel %vm1451_vm1, %v2674_v51, %v1450_v45  ;;  %v1459_v25 = vsel %vm1451_vm1, %v1450_v45, %v2393_v28  ;;  %v1307_v39 = vsel %vm1299_vm3, %v1298_v20, %v2387_v27  ;;  %v1300_v14 = vsel %vm1299_vm3, %v2621_v8, %v1298_v20 }
 0x1f6   :  { %v1509_v2 = vmul.f32 %v1490_v32, %v1452_v16  ;;  %v1510_v52 = vmul.f32 %v1494_v41, %v1459_v25  ;;  %2126 = vmatprep.subr.msk.bf16.mxu1 %vm1638_vm6, %v1626_v60  ;;  %v1358_v44 = vmul.f32 %v1342_v53, %v1307_v39  ;;  %v1658_v51 = vsel %vm1638_vm6, %v1625_v57, 0 }
 0x1f7   :  { %1760 = vmatpush1.bf16.msra.mxu0 %v1607_v34  ;;  %1799 = vmatpush1.bf16.msra.mxu1 %v1658_v51  ;;  %v1102_v27 = vrot.slane %v2629_v30, %v2689_v62  ;;  %v1357_v59 = vmul.f32 %v1338_v42, %v1300_v14  ;;  %v1182_v8 = vrot.slane %v2538_v21, %v2714_v48 }
 0x1f8   :  { %v1617_v19 = vpack.c.bf16 %v1509_v2, %v1433_v22  ;;  %v1142_v28 = vpop.permute.xlu0 %1141  ;;  %v1618_v29 = vpack.c.bf16 %v1510_v52, %v1434_v54  ;;  %v989_v4 = vpop.permute.xlu1 %988  ;;  %v1106_v62 = vrot.slane %v2629_v30, %v2714_v48  ;;  %v1610_v32 = vpack.c.bf16 %v1358_v44, %v2319_v17 }
 0x1f9   :  { %v1150_v43 = vsel %vm1147_vm5, %v2691_v15, %v1142_v28  ;;  %v1186_v41 = vrot.slane %v2538_v21, %v2785_v47  ;;  %v1190_v35 = vrot.slane %v2538_v21, %v2788_v7  ;;  %v1075_v15 = vsel %vm1071_vm7, %v2575_v10, %v2686_v13 }
 0x1fa   :  { %1800 = vmatprep.subr.bf16.mxu1 %v1618_v29  ;;  %v1224_v17 = vsel %vm1223_vm4, %v2829_v5, %v2745_v11  ;;  %v999_v24 = vsel %vm996_vm8, %v2665_v12, %v989_v4  ;;  %v1609_v38 = vpack.c.bf16 %v1357_v59, %v3071_v58  ;;  %v1204_v56 = vmul.f32 %v1182_v8, %v1150_v43 }
 0x1fb   :  { %1801 = vmatpush1.bf16.msra.mxu1 %v1617_v19  ;;  %v1114_v57 = vrot.slane %v2629_v30, %v2788_v7  ;;  %v1034_v60 = vrot.slane %v2649_v1, %v2785_v47  ;;  %v1052_v42 = vmul.f32 %v1030_v46, %v999_v24  ;;  %v1038_v34 = vrot.slane %v2649_v1, %v2788_v7 }
 0x1fc   :  { %v1218_v36 = vpop.permute.xlu0 %1217  ;;  %v1066_v48 = vpop.permute.xlu1 %1065  ;;  %1802 = vmatprep.subr.bf16.mxu1 %v1610_v32  ;;  %v1127_v22 = vmul.f32 %v1102_v27, %v1075_v15 }
 0x1fd   :  { %v1226_v21 = vsel %vm1223_vm4, %v2703_v9, %v1218_v36  ;;  %v1074_v10 = vsel %vm1071_vm7, %v2686_v13, %v1066_v48  ;;  %v1225_v11 = vsel %vm1223_vm4, %v1218_v36, %v2829_v5  ;;  %v1000_v9 = vsel %vm996_vm8, %v2567_v31, %v2665_v12 }
 0x1fe   :  { %v1280_v3 = vmul.f32 %v1258_v18, %v1226_v21  ;;  %v1128_v53 = vmul.f32 %v1106_v62, %v1074_v10  ;;  %v1282_v5 = vmul.f32 %v1266_v63, %v1224_v17  ;;  %v1281_v16 = vmul.f32 %v1262_v6, %v1225_v11 }
 0x1ff   :  { %1803 = vmatpush1.bf16.msra.mxu1 %v1609_v38  ;;  %v1051_v54 = vmul.f32 %v1026_v33, %v1000_v9 }
 0x200   :  { %v1144_v13 = vpop.permute.xlu0 %1143  ;;  %v1600_v45 = vpack.c.bf16 %v1280_v3, %v1204_v56  ;;  %v1068_v20 = vpop.permute.xlu1 %1067  ;;  %v1592_v12 = vpack.c.bf16 %v1128_v53, %v1052_v42 }
 0x201   :  { %v1148_v30 = vsel %vm1147_vm5, %v1144_v13, %v2701_v55  ;;  %v1149_v47 = vsel %vm1147_vm5, %v1142_v28, %v1144_v13  ;;  %v1072_v1 = vsel %vm1071_vm7, %v1068_v20, %v2766_v23  ;;  %v1073_v7 = vsel %vm1071_vm7, %v1066_v48, %v1068_v20 }
 0x202   :  { %v1205_v25 = vmul.f32 %v1186_v41, %v1149_v47  ;;  %v1206_v31 = vmul.f32 %v1190_v35, %v1148_v30  ;;  %1761 = vmatprep.subr.bf16.mxu0 %v1600_v45  ;;  %v1591_v52 = vpack.c.bf16 %v1127_v22, %v1051_v54  ;;  %v1129_v23 = vmul.f32 %v1110_v40, %v1073_v7 }
 0x203   :  { %1762 = vmatpush1.bf16.msra.mxu0 %v1599_v61  ;;  %v1130_v51 = vmul.f32 %v1114_v57, %v1072_v1 }
 0x204   :  { %v1601_v55 = vpack.c.bf16 %v1281_v16, %v1205_v25  ;;  %1763 = vmatprep.subr.bf16.mxu0 %v1592_v12  ;;  %v991_v39 = vpop.permute.xlu0 %990  ;;  %v1602_v2 = vpack.c.bf16 %v1282_v5, %v1206_v31 }
 0x205   :  { %v997_v14 = vsel %vm996_vm8, %v991_v39, %v2732_v26  ;;  %v998_v44 = vsel %vm996_vm8, %v989_v4, %v991_v39 }
 0x206   :  { %v1053_v19 = vmul.f32 %v1034_v60, %v998_v44  ;;  %v1054_v28 = vmul.f32 %v1038_v34, %v997_v14  ;;  %1804 = vmatprep.subr.bf16.mxu1 %v1602_v2 }
 0x207   :  { %1764 = vmatpush1.bf16.msra.mxu0 %v1591_v52  ;;  %1805 = vmatpush1.bf16.msra.mxu1 %v1601_v55 }
 0x208   :  { %v1593_v49 = vpack.c.bf16 %v1129_v23, %v1053_v19  ;;  %v1594_v50 = vpack.c.bf16 %v1130_v51, %v1054_v28 }
 0x20a   :  { %2125 = vmatmul.mubr.msk.bf16.vlgmr.msra.gmra.mxu0 %vm1634_vm9, %v2737_v0  ;;  %1806 = vmatprep.subr.bf16.mxu1 %v1594_v50 }
 0x20b   :  { %1807 = vmatpush1.bf16.msra.mxu1 %v1593_v49 }
 0x20e   :  { %2127 = vmatmul.mubr.msk.bf16.vlgmr.msra.gmra.mxu1 %vm1634_vm9, %v2737_v0 }
 0x2a2   :  { %v2950_v29 = vpop.f32.mrf.mxu1 }
 0x2a3   :  { %v1855_v46 = vmul.f32 %v2950_v29, %v2950_v29 }
 0x2a4   :  { %v2958_v63 = vpop.f32.mrf.mxu1 }
 0x2a5   :  { %v1856_v41 = vmul.f32 %v2958_v63, %v2958_v63 }
 0x2a6   :  { %v2968_v43 = vpop.f32.mrf.mxu1 }
 0x2a7   :  { %v1863_v36 = vmul.f32 %v2968_v43, %v2968_v43 }
 0x2a8   :  { %v2977_v35 = vpop.f32.mrf.mxu1 }
 0x2a9   :  { %v1864_v48 = vmul.f32 %v2977_v35, %v2977_v35 }
 0x2ad   :  { %v2944_v26 = vpop.f32.mrf.mxu0 }
 0x2ae   :  { %v1853_v33 = vmul.f32 %v2944_v26, %v2944_v26 }
 0x2af   :  { %v2946_v37 = vpop.f32.mrf.mxu0 }
 0x2b0   :  { %v1854_v27 = vmul.f32 %v2946_v37, %v2946_v37  ;;  %v1835_v0 = vadd.f32 %v2946_v37, %v2944_v26 }
 0x2b1   :  { %v2948_v61 = vpop.f32.mrf.mxu0 }
 0x2b2   :  { %v1861_v59 = vmul.f32 %v2948_v61, %v2948_v61  ;;  %v1869_v18 = vadd.f32 %v1854_v27, %v1853_v33  ;;  %v1836_v62 = vadd.f32 %v1835_v0, %v2950_v29 }
 0x2b3   :  { %v2956_v4 = vpop.f32.mrf.mxu0 }
 0x2b4   :  { %v1862_v8 = vmul.f32 %v2956_v4, %v2956_v4  ;;  %v1844_v32 = vadd.f32 %v2956_v4, %v2948_v61  ;;  %v1870_v40 = vadd.f32 %v1869_v18, %v1855_v46  ;;  %v1837_v15 = vadd.f32 %v1836_v62, %v2958_v63 }
 0x2b6   :  { %v1878_v6 = vadd.f32 %v1862_v8, %v1861_v59  ;;  %v1845_v17 = vadd.f32 %v1844_v32, %v2968_v43  ;;  %v1871_v58 = vadd.f32 %v1870_v40, %v1856_v41  ;;  %v1898_v32 = vld [vmem:[%s3062_s4] sm:$0xff] }
 0x2b7   :  { %v1900_v40 = vld [vmem:[%s3063_s5] sm:$0xff] }
 0x2b8   :  { %v1879_v24 = vadd.f32 %v1878_v6, %v1863_v36  ;;  %v1846_v3 = vadd.f32 %v1845_v17, %v2977_v35 }
 0x2ba   :  { %v1880_v60 = vadd.f32 %v1879_v24, %v1864_v48 }
 0x2ca   :  { %v2983_v21 = vpop.f32.mrf.mxu0 }
 0x2cb   :  { %v1838_v38 = vadd.f32 %v1837_v15, %v2983_v21  ;;  %v1857_v56 = vmul.f32 %v2983_v21, %v2983_v21 }
 0x2cc   :  { %v1785_v10 = vpop.f32.mrf.mxu0 }
 0x2cd   :  { %v1872_v53 = vadd.f32 %v1871_v58, %v1857_v56  ;;  %v1839_v11 = vadd.f32 %v1838_v38, %v1785_v10  ;;  %v1858_v57 = vmul.f32 %v1785_v10, %v1785_v10 }
 0x2ce   :  { %v2989_v9 = vpop.f32.mrf.mxu0  ;;  %v1826_v42 = vpop.f32.mrf.mxu1 }
 0x2cf   :  { %v1847_v13 = vadd.f32 %v1846_v3, %v2989_v9  ;;  %v1865_v45 = vmul.f32 %v2989_v9, %v2989_v9  ;;  %v1859_v34 = vmul.f32 %v1826_v42, %v1826_v42  ;;  %v1840_v22 = vadd.f32 %v1839_v11, %v1826_v42 }
 0x2d0   :  { %v1789_v5 = vpop.f32.mrf.mxu0  ;;  %v1828_v20 = vpop.f32.mrf.mxu1  ;;  %v1873_v30 = vadd.f32 %v1872_v53, %v1858_v57 }
 0x2d1   :  { %v1881_v47 = vadd.f32 %v1880_v60, %v1865_v45  ;;  %v1848_v16 = vadd.f32 %v1847_v13, %v1789_v5  ;;  %v1866_v25 = vmul.f32 %v1789_v5, %v1789_v5  ;;  %v1841_v31 = vadd.f32 %v1840_v22, %v1828_v20 }
 0x2d2   :  { %v1830_v12 = vpop.f32.mrf.mxu1  ;;  %v1860_v54 = vmul.f32 %v1828_v20, %v1828_v20  ;;  %v1874_v1 = vadd.f32 %v1873_v30, %v1859_v34 }
 0x2d3   :  { %v1882_v7 = vadd.f32 %v1881_v47, %v1866_v25  ;;  %v1867_v55 = vmul.f32 %v1830_v12, %v1830_v12  ;;  %1842 = vadd.xlane.f32.xlu0 %v1841_v31  ;;  %v1849_v39 = vadd.f32 %v1848_v16, %v1830_v12 }
 0x2d4   :  { %v1832_v2 = vpop.f32.mrf.mxu1  ;;  %v1875_v14 = vadd.f32 %v1874_v1, %v1860_v54 }
 0x2d5   :  { %v1868_v52 = vmul.f32 %v1832_v2, %v1832_v2  ;;  %v1850_v44 = vadd.f32 %v1849_v39, %v1832_v2  ;;  %v1883_v23 = vadd.f32 %v1882_v7, %v1867_v55 }
 0x2d7   :  { %1876 = vadd.xlane.f32.xlu0 %v1875_v14  ;;  %1851 = vadd.xlane.f32.xlu1 %v1850_v44  ;;  %v1884_v51 = vadd.f32 %v1883_v23, %v1868_v52 }
 0x2db   :  { %1885 = vadd.xlane.f32.xlu0 %v1884_v51 }
 0x35c   :  { %v1843_v19 = vpop.xlane.xlu0 %1842 }
 0x360   :  { %v1877_v28 = vpop.xlane.xlu0 %1876  ;;  %v1852_v49 = vpop.xlane.xlu1 %1851 }
 0x361   :  { %v1889_v50 = vadd.f32 %v1852_v49, %v1843_v19 }
 0x363   :  { %v1891_v33 = vmul.f32 0.00048828125, %v1889_v50 }
 0x364   :  { %v1886_v27 = vpop.xlane.xlu0 %1885 }
 0x365   :  { %v1890_v0 = vadd.f32 %v1886_v27, %v1877_v28  ;;  %v1893_v59 = vmul.f32 %v1891_v33, %v1891_v33 }
 0x367   :  { %v1892_v8 = vmul.f32 0.00048828125, %v1890_v0 }
 0x369   :  { %v1894_v18 = vsub.f32 %v1892_v8, %v1893_v59 }
 0x36b   :  { %v1895_v46 = vmax.f32 %v1894_v18, 0.0 }
 0x36d   :  { %v1896_v62 = vadd.f32 1e-05, %v1895_v46 }
 0x36f   :  { %2144 = vrsqrt.f32 %v1896_v62 }
 0x37c   :  { %v2145_v6 = vpop.eup %2144 }
 0x37d   :  { %v1899_v36 = vmul.f32 %v2145_v6, %v1898_v32 }
 0x37f   :  { %1905 = vperm.xlu1 %2139, %v1899_v36   ;;  %v1901_v41 = vmul.f32 %v1899_v36, %v1891_v33 }
 0x381   :  { %v1902_v15 = vsub.f32 %v1900_v40, %v1901_v41 }
 0x383   :  { %1926 = vperm.xlu0 %2140, %v1902_v15  }
 0x3fa   :  { %v1906_v17 = vpop.permute.xlu1 %1905 }
 0x3fb   :  { %v1908_v24 = vmul.f32 %v1906_v17, %v2944_v26  ;;  %v1909_v48 = vmul.f32 %v1906_v17, %v2946_v37  ;;  %v1910_v58 = vmul.f32 %v1906_v17, %v2950_v29  ;;  %v1911_v38 = vmul.f32 %v1906_v17, %v2958_v63 }
 0x3fc   :  { %v1912_v56 = vmul.f32 %v1906_v17, %v2983_v21  ;;  %v1913_v3 = vmul.f32 %v1906_v17, %v1785_v10  ;;  %v1914_v53 = vmul.f32 %v1906_v17, %v1826_v42  ;;  %v1915_v11 = vmul.f32 %v1906_v17, %v1828_v20 }
 0x3fd   :  { %v1916_v57 = vmul.f32 %v1906_v17, %v2948_v61  ;;  %v1917_v60 = vmul.f32 %v1906_v17, %v2956_v4  ;;  %v1918_v13 = vmul.f32 %v1906_v17, %v2968_v43  ;;  %v1919_v45 = vmul.f32 %v1906_v17, %v2977_v35 }
 0x3fe   :  { %v1920_v26 = vmul.f32 %v1906_v17, %v2989_v9  ;;  %v1921_v37 = vmul.f32 %v1906_v17, %v1789_v5  ;;  %v1922_v34 = vmul.f32 %v1906_v17, %v1830_v12  ;;  %v1923_v29 = vmul.f32 %v1906_v17, %v1832_v2  ;;  %v1927_v22 = vpop.permute.xlu0 %1926 }
 0x3ff   :  { %v1929_v63 = vadd.f32 %v1927_v22, %v1908_v24  ;;  %v1930_v30 = vadd.f32 %v1927_v22, %v1909_v48  ;;  %v1931_v21 = vadd.f32 %v1927_v22, %v1910_v58  ;;  %v1932_v10 = vadd.f32 %v1927_v22, %v1911_v38 }
 0x400   :  { %v1933_v42 = vadd.f32 %v1927_v22, %v1912_v56  ;;  %v1934_v20 = vadd.f32 %v1927_v22, %v1913_v3  ;;  %v1935_v47 = vadd.f32 %v1927_v22, %v1914_v53  ;;  %v1936_v61 = vadd.f32 %v1927_v22, %v1915_v11 }
 0x401   :  { %v1937_v16 = vadd.f32 %v1927_v22, %v1916_v57  ;;  %v1938_v4 = vadd.f32 %v1927_v22, %v1917_v60  ;;  %v1939_v25 = vadd.f32 %v1927_v22, %v1918_v13  ;;  %v1940_v43 = vadd.f32 %v1927_v22, %v1919_v45 }
 0x402   :  { %v1941_v31 = vadd.f32 %v1927_v22, %v1920_v26  ;;  %v1942_v35 = vadd.f32 %v1927_v22, %v1921_v37  ;;  %v1943_v54 = vadd.f32 %v1927_v22, %v1922_v34  ;;  %v1944_v9 = vadd.f32 %v1927_v22, %v1923_v29 }
 0x403   :  { %v1945_v5 = vmax.f32 %v1929_v63, 0.0  ;;  %v1946_v12 = vmax.f32 %v1930_v30, 0.0  ;;  %v1947_v1 = vmax.f32 %v1931_v21, 0.0  ;;  %v1948_v7 = vmax.f32 %v1932_v10, 0.0 }
 0x404   :  { %v1949_v55 = vmax.f32 %v1933_v42, 0.0  ;;  %v1950_v39 = vmax.f32 %v1934_v20, 0.0  ;;  %v1951_v2 = vmax.f32 %v1935_v47, 0.0  ;;  %v1952_v52 = vmax.f32 %v1936_v61, 0.0 }
 0x405   :  { %v1953_v14 = vmax.f32 %v1937_v16, 0.0  ;;  %v1954_v44 = vmax.f32 %v1938_v4, 0.0  ;;  %v1955_v23 = vmax.f32 %v1939_v25, 0.0  ;;  %v1956_v51 = vmax.f32 %v1940_v43, 0.0  ;;  %1961 = vst [vmem:[%s3064_s6] sm:$0xff] %v1945_v5  ;;  %1962 = vst [vmem:[%s3064_s6 + $0x8] sm:$0xff] %v1946_v12 }
 0x406   :  { %1963 = vst [vmem:[%s3064_s6 + $0x10] sm:$0xff] %v1947_v1  ;;  %1964 = vst [vmem:[%s3064_s6 + $0x18] sm:$0xff] %v1948_v7  ;;  %v1957_v19 = vmax.f32 %v1941_v31, 0.0  ;;  %v1958_v28 = vmax.f32 %v1942_v35, 0.0  ;;  %v1959_v49 = vmax.f32 %v1943_v54, 0.0  ;;  %v1960_v50 = vmax.f32 %v1944_v9, 0.0 }
 0x407   :  { %1965 = vst [vmem:[%s3064_s6 + $0x20] sm:$0xff] %v1949_v55  ;;  %1966 = vst [vmem:[%s3064_s6 + $0x28] sm:$0xff] %v1950_v39 }
 0x408   :  { %1967 = vst [vmem:[%s3064_s6 + $0x30] sm:$0xff] %v1951_v2  ;;  %1968 = vst [vmem:[%s3064_s6 + $0x38] sm:$0xff] %v1952_v52 }
 0x409   :  { %1969 = vst [vmem:[%s3064_s6 + $0x40] sm:$0xff] %v1953_v14  ;;  %1970 = vst [vmem:[%s3064_s6 + $0x48] sm:$0xff] %v1954_v44 }
 0x40a   :  { %1971 = vst [vmem:[%s3064_s6 + $0x50] sm:$0xff] %v1955_v23  ;;  %1972 = vst [vmem:[%s3064_s6 + $0x58] sm:$0xff] %v1956_v51 }
 0x40b   :  { %1973 = vst [vmem:[%s3064_s6 + $0x60] sm:$0xff] %v1957_v19  ;;  %1974 = vst [vmem:[%s3064_s6 + $0x68] sm:$0xff] %v1958_v28 }
 0x40c   :  { %1975 = vst [vmem:[%s3064_s6 + $0x70] sm:$0xff] %v1959_v49  ;;  %1976 = vst [vmem:[%s3064_s6 + $0x78] sm:$0xff] %v1960_v50 }
 0x40d   :  { %1981 = vsyncpa [#allocation3], 1 }

</bundles_post_ra>
